<compile_context>
chip_gen: v6e
topology: v6e:2x2x1
jax: 0.10.0
libtpu: 0.0.40
codegen_flags: <defaults>
</compile_context>

<pallas_src>
import functools

import jax
import jax.numpy as jnp
from jax import lax
from jax.experimental import pallas as pl
from jax.experimental.pallas import tpu as pltpu

_LANE = 128  # TPU lane width; hidden dim is padded to a multiple of this.


def _round_up(x, m):
    return (x + m - 1) // m * m


def _choose_block_b(b, n, hp, *, row_bytes_budget=8 << 20, min_grid=2):
    """Largest Be dividing b such that grid = b//Be stays >= min_grid (when
    possible) and ~4 live (Be*N, Hp) f32 buffers fit the row budget."""
    max_rows = max(n, row_bytes_budget // max(1, 4 * hp * 4))
    best = 1
    for be in range(1, b + 1):
        if b % be:
            continue
        if (b // be) < min(min_grid, b):
            continue
        if be * n > max_rows:
            continue
        best = be
    return best


def _fc_block(x2d, w, gamma, beta, *, be, n, eps, slope):
    """Bias-free Linear -> BatchNorm1d (per-episode batch stats) -> LeakyReLU.

    x2d is (Be*N, F_in); w is resident in its storage dtype (bf16 or f32) and
    is never re-cast.  BN normalize+affine is folded into one scale/shift with
    single-pass (clamped) stats per episode.  Output is f32 (Be*N, Hp).
    """
    h = jnp.dot(x2d.astype(w.dtype), w,
                preferred_element_type=jnp.float32)           # (Be*N, Hp) f32
    hp = h.shape[-1]
    h3 = h.reshape(be, n, hp)                                 # per-episode view
    inv_n = jnp.float32(1.0 / n)
    mean = jnp.sum(h3, axis=1, keepdims=True) * inv_n         # (Be, 1, Hp)
    var = jnp.sum(h3 * h3, axis=1, keepdims=True) * inv_n - mean * mean
    var = jnp.maximum(var, 0.0)                               # guard rsqrt(neg)
    scale = gamma * lax.rsqrt(var + eps)                      # rsqrt -> EUP
    shift = beta - mean * scale
    h3 = h3 * scale + shift                                   # 2 VPU ops/elem
    h3 = jnp.maximum(h3, slope * h3)                          # LeakyReLU(0.01)
    return h3.reshape(be * n, hp)


def fcnet_kernel(x_ref, w1_ref, w2_ref, bn_ref, o_ref, *, eps, slope):
    # x_ref: (Be, N, F)   w1_ref: (F, Hp)   w2_ref: (Hp, Hp)
    # bn_ref: (8, Hp) packed rows [g1, be1, g2, be2, 0, 0, 0, 0]
    # o_ref: (Be, N, Hp)  -- Hp multiple of 128 -> lane-dense stores.
    be, n, f = x_ref.shape
    hp = w1_ref.shape[1]
    x2d = x_ref[...].reshape(be * n, f)
    g1, b1 = bn_ref[0:1, :], bn_ref[1:2, :]
    g2, b2 = bn_ref[2:3, :], bn_ref[3:4, :]
    blk = functools.partial(_fc_block, be=be, n=n, eps=eps, slope=slope)
    h1 = blk(x2d, w1_ref[...], g1, b1)
    h2 = blk(h1, w2_ref[...], g2, b2)
    o_ref[...] = h2.reshape(be, n, hp).astype(o_ref.dtype)


def pack_params(params, *, param_dtype=jnp.bfloat16):
    """Pad/pack FCNet params once: w1 (F,Hp), w2 (Hp,Hp) in `param_dtype`,
    BN affine slab (8,Hp) in f32.

    Linear biases b1/b2 are NOT packed -- they are exactly cancelled by the
    training-mode BatchNorm mean subtraction.  Zero-padded columns stay
    exactly zero through both layers (gamma_pad = 0 => scale = 0 => BN output
    0, and w2's padded rows are zero).
    """
    w1, w2 = params["w1"], params["w2"]
    x_dim, hid = w1.shape
    hp = _round_up(hid, _LANE)
    w1p = jnp.zeros((x_dim, hp), param_dtype).at[:, :hid].set(
        w1.astype(param_dtype))
    w2p = jnp.zeros((hp, hp), param_dtype).at[:hid, :hid].set(
        w2.astype(param_dtype))
    bn = jnp.zeros((8, hp), jnp.float32)
    bn = bn.at[0, :hid].set(params["g1"].reshape(-1))
    bn = bn.at[1, :hid].set(params["be1"].reshape(-1))
    bn = bn.at[2, :hid].set(params["g2"].reshape(-1))
    bn = bn.at[3, :hid].set(params["be2"].reshape(-1))
    return dict(w1=w1p, w2=w2p, bn=bn, hid=hid)


def _param_spec(shape, single_buffer):
    if single_buffer:
        return pl.BlockSpec(shape, lambda i: (0, 0),
                            pipeline_mode=pl.Buffered(1))
    return pl.BlockSpec(shape, lambda i: (0, 0))


def fcnet_forward(x, packed, *, block_b=None, unpad=True,
                  out_dtype=jnp.float32):
    """FCNet forward.  x: (N, x_dim) single episode or (B, N, x_dim) batched.

    BN stats are computed per episode (per leading index), matching one
    PyTorch FCNet.forward per episode.  `unpad=False` keeps the lane-padded
    (.., Hp) output (padded columns are exactly zero), avoiding the post-kernel
    HBM slice.
    """
    squeeze = (x.ndim == 2)
    if squeeze:
        x = x[None]
    b, n, f = x.shape
    hp = packed["w1"].shape[1]
    hid = packed["hid"]
    w_dtype = packed["w1"].dtype
    x = x.astype(w_dtype)          # cast once; bf16 mode halves per-step x DMA

    be = block_b if block_b is not None else _choose_block_b(b, n, hp)
    if b % be != 0:
        raise ValueError(f"block_b={be} must divide batch {b}")
    grid = (b // be,)

    # VMEM budget: x/out blocks (double-buffered) + resident params + ~5 live
    # f32 (Be*N, Hp) intermediates, with 2x headroom, clamped for v7x (64 MiB).
    itemsize_w = jnp.dtype(w_dtype).itemsize
    itemsize_o = jnp.dtype(out_dtype).itemsize
    rows = be * n
    w_bytes = (f * hp + hp * hp) * itemsize_w + 8 * hp * 4
    est = (2 * rows * f * itemsize_w
           + 2 * rows * hp * itemsize_o
           + 2 * w_bytes
           + 5 * rows * hp * 4)
    vmem_limit = int(min(48 << 20, max(16 << 20, 2 * est)))

    kern = functools.partial(fcnet_kernel, eps=1e-5, slope=0.01)

    def run(single_buffer_params):
        call = pl.pallas_call(
            kern,
            out_shape=jax.ShapeDtypeStruct((b, n, hp), out_dtype),
            grid=grid,
            in_specs=[
                pl.BlockSpec((be, n, f), lambda i: (i, 0, 0)),   # Be episodes
                _param_spec((f, hp), single_buffer_params),      # w1 resident
                _param_spec((hp, hp), single_buffer_params),     # w2 resident
                _param_spec((8, hp), single_buffer_params),      # packed BN
            ],
            out_specs=pl.BlockSpec((be, n, hp), lambda i: (i, 0, 0)),
            compiler_params=pltpu.CompilerParams(
                dimension_semantics=("parallel",),               # megacore v7x
                vmem_limit_bytes=vmem_limit),
        )
        return call(x, packed["w1"], packed["w2"], packed["bn"])

    try:
        out = run(True)
    except Exception:
        # Fallback if this jax build rejects pl.Buffered(1) on resident inputs.
        out = run(False)

    if unpad:
        out = out[..., :hid]      # drop lane padding back to hid
    if squeeze:
        out = out[0]
    return out


def init_params(key, x_dim, hid_dim):
    k = jax.random.split(key, 8)
    # PyTorch stores Linear W as (out, in); we keep the transposed (in, out).
    w1 = jax.random.uniform(k[0], (x_dim, hid_dim), jnp.float32, -0.1, 0.1)
    b1 = jax.random.uniform(k[1], (1, hid_dim), jnp.float32, -0.1, 0.1)
    w2 = jax.random.uniform(k[2], (hid_dim, hid_dim), jnp.float32, -0.1, 0.1)
    b2 = jax.random.uniform(k[3], (1, hid_dim), jnp.float32, -0.1, 0.1)
    # BatchNorm affine params (perturbed so the affine path is exercised).
    g1 = 1.0 + 0.05 * jax.random.normal(k[4], (1, hid_dim), jnp.float32)
    be1 = 0.05 * jax.random.normal(k[5], (1, hid_dim), jnp.float32)
    g2 = 1.0 + 0.05 * jax.random.normal(k[6], (1, hid_dim), jnp.float32)
    be2 = 0.05 * jax.random.normal(k[7], (1, hid_dim), jnp.float32)
    return dict(w1=w1, b1=b1, g1=g1, be1=be1, w2=w2, b2=b2, g2=g2, be2=be2)


def reference_forward(x, p):
    """Pure-JAX reference with exact PyTorch semantics (biases included)."""
    def blk(x, w, b, g, be):
        h = x @ w + b
        m = h.mean(0, keepdims=True)
        v = ((h - m) ** 2).mean(0, keepdims=True)
        h = (h - m) / jnp.sqrt(v + 1e-5) * g + be
        return jnp.where(h >= 0, h, 0.01 * h)
    h1 = blk(x, p["w1"], p["b1"], p["g1"], p["be1"])
    return blk(h1, p["w2"], p["b2"], p["g2"], p["be2"])


if __name__ == "__main__":
    key = jax.random.PRNGKey(0)
    kx, kp = jax.random.split(key)

    B, N, X_DIM, HID_DIM = 8, 8, 16, 32
    x_batched = jax.random.normal(kx, (B, N, X_DIM), jnp.float32)
    params = init_params(kp, X_DIM, HID_DIM)

    ref_b = jax.vmap(lambda xe: reference_forward(xe, params))(x_batched)

    # f32 parameter pack: bit-tight check against the f32 reference.
    packed_f32 = pack_params(params, param_dtype=jnp.float32)
    out_f32 = jax.block_until_ready(fcnet_forward(x_batched, packed_f32))
    assert out_f32.shape == (B, N, HID_DIM)
    assert jnp.allclose(out_f32, ref_b, atol=1e-4, rtol=1e-4)

    # bf16 parameter pack (default): halved weight DMA/VMEM, looser tolerance.
    packed_bf16 = pack_params(params)
    out_bf16 = jax.block_until_ready(fcnet_forward(x_batched, packed_bf16))
    assert out_bf16.shape == (B, N, HID_DIM)
    assert bool(jnp.all(jnp.isfinite(out_bf16)))
    assert jnp.allclose(out_bf16, ref_b, atol=1e-1, rtol=1e-1)

    # Single-episode path (the original module signature: x is (N, x_dim)).
    x_single = x_batched[0]
    out_s = jax.block_until_ready(fcnet_forward(x_single, packed_f32))
    ref_s = reference_forward(x_single, params)
    assert out_s.shape == (N, HID_DIM)
    assert jnp.allclose(out_s, ref_s, atol=1e-4, rtol=1e-4)

    print("KERNEL_OK")
</pallas_src>

<mosaic_0001>
module attributes {stable_mosaic.version = 11 : i64} {
  func.func @fcnet_kernel(%arg0: i32, %arg1: memref<4x8x16xf32, #tpu.memory_space<vmem>>, %arg2: memref<16x128xf32, #tpu.memory_space<vmem>>, %arg3: memref<128x128xf32, #tpu.memory_space<vmem>>, %arg4: memref<8x128xf32, #tpu.memory_space<vmem>>, %arg5: memref<4x8x128xf32, #tpu.memory_space<vmem>>) attributes {dimension_semantics = [#tpu.dimension_semantics<parallel>], iteration_bounds = array<i64: 2>, scalar_prefetch = 0 : i64, scratch_operands = 0 : i64, tpu.core_type = #tpu.core_type<tc>, window_params = [{transform_indices = @transform_0, window_bounds = array<i64: 4, 8, 16>}, {pipeline_mode = #tpu.pipeline_mode<synchronous>, transform_indices = @transform_1, window_bounds = array<i64: 16, 128>}, {pipeline_mode = #tpu.pipeline_mode<synchronous>, transform_indices = @transform_2, window_bounds = array<i64: 128, 128>}, {pipeline_mode = #tpu.pipeline_mode<synchronous>, transform_indices = @transform_3, window_bounds = array<i64: 8, 128>}, {transform_indices = @transform_4, window_bounds = array<i64: 4, 8, 128>}]} {
    %c0 = arith.constant 0 : index
    %c0_0 = arith.constant 0 : index
    %c0_1 = arith.constant 0 : index
    %0 = vector.load %arg1[%c0, %c0_0, %c0_1] : memref<4x8x16xf32, #tpu.memory_space<vmem>>, vector<4x8x16xf32>
    %1 = vector.shape_cast %0 : vector<4x8x16xf32> to vector<32x16xf32>
    %c0_2 = arith.constant 0 : index
    %c0_3 = arith.constant 0 : index
    %2 = vector.load %arg4[%c0_2, %c0_3] : memref<8x128xf32, #tpu.memory_space<vmem>>, vector<1x128xf32>
    %c1 = arith.constant 1 : index
    %c0_4 = arith.constant 0 : index
    %3 = vector.load %arg4[%c1, %c0_4] : memref<8x128xf32, #tpu.memory_space<vmem>>, vector<1x128xf32>
    %c2 = arith.constant 2 : index
    %c0_5 = arith.constant 0 : index
    %4 = vector.load %arg4[%c2, %c0_5] : memref<8x128xf32, #tpu.memory_space<vmem>>, vector<1x128xf32>
    %c3 = arith.constant 3 : index
    %c0_6 = arith.constant 0 : index
    %5 = vector.load %arg4[%c3, %c0_6] : memref<8x128xf32, #tpu.memory_space<vmem>>, vector<1x128xf32>
    %c0_7 = arith.constant 0 : index
    %c0_8 = arith.constant 0 : index
    %6 = vector.load %arg2[%c0_7, %c0_8] : memref<16x128xf32, #tpu.memory_space<vmem>>, vector<16x128xf32>
    %cst = arith.constant dense<0.000000e+00> : vector<32x128xf32>
    %7 = tpu.matmul %1, %6, %cst {dimension_numbers = #tpu.dot_dimension_numbers<[1], [0], [0], [1], [0, 0, 1, 1], [], []>} : vector<32x16xf32>, vector<16x128xf32>, vector<32x128xf32> -> vector<32x128xf32>
    %8 = vector.shape_cast %7 : vector<32x128xf32> to vector<4x8x128xf32>
    %cst_9 = arith.constant dense<0.000000e+00> : vector<4x128xf32>
    %9 = vector.multi_reduction <add>, %8, %cst_9 [1] : vector<4x8x128xf32> to vector<4x128xf32>
    %10 = vector.shape_cast %9 : vector<4x128xf32> to vector<4x1x128xf32>
    %cst_10 = arith.constant 1.250000e-01 : f32
    %11 = vector.broadcast %cst_10 : f32 to vector<4x1x128xf32>
    %12 = arith.mulf %10, %11 : vector<4x1x128xf32>
    %13 = arith.mulf %8, %8 : vector<4x8x128xf32>
    %cst_11 = arith.constant dense<0.000000e+00> : vector<4x128xf32>
    %14 = vector.multi_reduction <add>, %13, %cst_11 [1] : vector<4x8x128xf32> to vector<4x128xf32>
    %15 = vector.shape_cast %14 : vector<4x128xf32> to vector<4x1x128xf32>
    %cst_12 = arith.constant 1.250000e-01 : f32
    %16 = vector.broadcast %cst_12 : f32 to vector<4x1x128xf32>
    %17 = arith.mulf %15, %16 : vector<4x1x128xf32>
    %18 = arith.mulf %12, %12 : vector<4x1x128xf32>
    %19 = arith.subf %17, %18 : vector<4x1x128xf32>
    %cst_13 = arith.constant 0.000000e+00 : f32
    %20 = vector.broadcast %cst_13 : f32 to vector<4x1x128xf32>
    %21 = arith.maximumf %19, %20 : vector<4x1x128xf32>
    %cst_14 = arith.constant 9.99999974E-6 : f32
    %22 = vector.broadcast %cst_14 : f32 to vector<4x1x128xf32>
    %23 = arith.addf %21, %22 : vector<4x1x128xf32>
    %24 = math.rsqrt %23 : vector<4x1x128xf32>
    %25 = vector.shape_cast %2 : vector<1x128xf32> to vector<1x1x128xf32>
    %26 = vector.broadcast %25 : vector<1x1x128xf32> to vector<4x1x128xf32>
    %27 = arith.mulf %26, %24 : vector<4x1x128xf32>
    %28 = arith.mulf %12, %27 : vector<4x1x128xf32>
    %29 = vector.shape_cast %3 : vector<1x128xf32> to vector<1x1x128xf32>
    %30 = vector.broadcast %29 : vector<1x1x128xf32> to vector<4x1x128xf32>
    %31 = arith.subf %30, %28 : vector<4x1x128xf32>
    %32 = vector.broadcast %27 : vector<4x1x128xf32> to vector<4x8x128xf32>
    %33 = arith.mulf %8, %32 : vector<4x8x128xf32>
    %34 = vector.broadcast %31 : vector<4x1x128xf32> to vector<4x8x128xf32>
    %35 = arith.addf %33, %34 : vector<4x8x128xf32>
    %cst_15 = arith.constant 0.00999999977 : f32
    %36 = vector.broadcast %cst_15 : f32 to vector<4x8x128xf32>
    %37 = arith.mulf %36, %35 : vector<4x8x128xf32>
    %38 = arith.maximumf %35, %37 : vector<4x8x128xf32>
    %39 = vector.shape_cast %38 : vector<4x8x128xf32> to vector<32x128xf32>
    %c0_16 = arith.constant 0 : index
    %c0_17 = arith.constant 0 : index
    %40 = vector.load %arg3[%c0_16, %c0_17] : memref<128x128xf32, #tpu.memory_space<vmem>>, vector<128x128xf32>
    %cst_18 = arith.constant dense<0.000000e+00> : vector<32x128xf32>
    %41 = tpu.matmul %39, %40, %cst_18 {dimension_numbers = #tpu.dot_dimension_numbers<[1], [0], [0], [1], [0, 0, 1, 1], [], []>} : vector<32x128xf32>, vector<128x128xf32>, vector<32x128xf32> -> vector<32x128xf32>
    %42 = vector.shape_cast %41 : vector<32x128xf32> to vector<4x8x128xf32>
    %cst_19 = arith.constant dense<0.000000e+00> : vector<4x128xf32>
    %43 = vector.multi_reduction <add>, %42, %cst_19 [1] : vector<4x8x128xf32> to vector<4x128xf32>
    %44 = vector.shape_cast %43 : vector<4x128xf32> to vector<4x1x128xf32>
    %cst_20 = arith.constant 1.250000e-01 : f32
    %45 = vector.broadcast %cst_20 : f32 to vector<4x1x128xf32>
    %46 = arith.mulf %44, %45 : vector<4x1x128xf32>
    %47 = arith.mulf %42, %42 : vector<4x8x128xf32>
    %cst_21 = arith.constant dense<0.000000e+00> : vector<4x128xf32>
    %48 = vector.multi_reduction <add>, %47, %cst_21 [1] : vector<4x8x128xf32> to vector<4x128xf32>
    %49 = vector.shape_cast %48 : vector<4x128xf32> to vector<4x1x128xf32>
    %cst_22 = arith.constant 1.250000e-01 : f32
    %50 = vector.broadcast %cst_22 : f32 to vector<4x1x128xf32>
    %51 = arith.mulf %49, %50 : vector<4x1x128xf32>
    %52 = arith.mulf %46, %46 : vector<4x1x128xf32>
    %53 = arith.subf %51, %52 : vector<4x1x128xf32>
    %cst_23 = arith.constant 0.000000e+00 : f32
    %54 = vector.broadcast %cst_23 : f32 to vector<4x1x128xf32>
    %55 = arith.maximumf %53, %54 : vector<4x1x128xf32>
    %cst_24 = arith.constant 9.99999974E-6 : f32
    %56 = vector.broadcast %cst_24 : f32 to vector<4x1x128xf32>
    %57 = arith.addf %55, %56 : vector<4x1x128xf32>
    %58 = math.rsqrt %57 : vector<4x1x128xf32>
    %59 = vector.shape_cast %4 : vector<1x128xf32> to vector<1x1x128xf32>
    %60 = vector.broadcast %59 : vector<1x1x128xf32> to vector<4x1x128xf32>
    %61 = arith.mulf %60, %58 : vector<4x1x128xf32>
    %62 = arith.mulf %46, %61 : vector<4x1x128xf32>
    %63 = vector.shape_cast %5 : vector<1x128xf32> to vector<1x1x128xf32>
    %64 = vector.broadcast %63 : vector<1x1x128xf32> to vector<4x1x128xf32>
    %65 = arith.subf %64, %62 : vector<4x1x128xf32>
    %66 = vector.broadcast %61 : vector<4x1x128xf32> to vector<4x8x128xf32>
    %67 = arith.mulf %42, %66 : vector<4x8x128xf32>
    %68 = vector.broadcast %65 : vector<4x1x128xf32> to vector<4x8x128xf32>
    %69 = arith.addf %67, %68 : vector<4x8x128xf32>
    %cst_25 = arith.constant 0.00999999977 : f32
    %70 = vector.broadcast %cst_25 : f32 to vector<4x8x128xf32>
    %71 = arith.mulf %70, %69 : vector<4x8x128xf32>
    %72 = arith.maximumf %69, %71 : vector<4x8x128xf32>
    %73 = vector.shape_cast %72 : vector<4x8x128xf32> to vector<32x128xf32>
    %74 = vector.shape_cast %73 : vector<32x128xf32> to vector<4x8x128xf32>
    %c0_26 = arith.constant 0 : index
    %c0_27 = arith.constant 0 : index
    %c0_28 = arith.constant 0 : index
    %75 = vector.load %arg5[%c0_26, %c0_27, %c0_28] : memref<4x8x128xf32, #tpu.memory_space<vmem>>, vector<4x8x128xf32>
    tpu.vector_store %arg5[%c0_26, %c0_27, %c0_28], %74 {strides = array<i32>} : memref<4x8x128xf32, #tpu.memory_space<vmem>>, vector<4x8x128xf32>,
    return
  }
  func.func @transform_0(%arg0: i32) -> (i32, i32, i32) {
    %c0_i32 = arith.constant 0 : i32
    %c0_i32_0 = arith.constant 0 : i32
    %c0_i32_1 = arith.constant 0 : i32
    return %arg0, %c0_i32, %c0_i32_0 : i32, i32, i32
  }
  func.func @transform_1(%arg0: i32) -> (i32, i32) {
    %c0_i32 = arith.constant 0 : i32
    %c0_i32_0 = arith.constant 0 : i32
    %c0_i32_1 = arith.constant 0 : i32
    return %c0_i32, %c0_i32_0 : i32, i32
  }
  func.func @transform_2(%arg0: i32) -> (i32, i32) {
    %c0_i32 = arith.constant 0 : i32
    %c0_i32_0 = arith.constant 0 : i32
    %c0_i32_1 = arith.constant 0 : i32
    return %c0_i32, %c0_i32_0 : i32, i32
  }
  func.func @transform_3(%arg0: i32) -> (i32, i32) {
    %c0_i32 = arith.constant 0 : i32
    %c0_i32_0 = arith.constant 0 : i32
    %c0_i32_1 = arith.constant 0 : i32
    return %c0_i32, %c0_i32_0 : i32, i32
  }
  func.func @transform_4(%arg0: i32) -> (i32, i32, i32) {
    %c0_i32 = arith.constant 0 : i32
    %c0_i32_0 = arith.constant 0 : i32
    %c0_i32_1 = arith.constant 0 : i32
    return %arg0, %c0_i32, %c0_i32_0 : i32, i32, i32
  }
}

module attributes {stable_mosaic.version = 11 : i64} {
  func.func @fcnet_kernel(%arg0: i32, %arg1: memref<4x8x16xf32, #tpu.memory_space<vmem>>, %arg2: memref<16x128xf32, #tpu.memory_space<vmem>>, %arg3: memref<128x128xf32, #tpu.memory_space<vmem>>, %arg4: memref<8x128xf32, #tpu.memory_space<vmem>>, %arg5: memref<4x8x128xf32, #tpu.memory_space<vmem>>) attributes {dimension_semantics = [#tpu.dimension_semantics<parallel>], iteration_bounds = array<i64: 2>, scalar_prefetch = 0 : i64, scratch_operands = 0 : i64, tpu.core_type = #tpu.core_type<tc>, window_params = [{transform_indices = @transform_0, window_bounds = array<i64: 4, 8, 16>}, {pipeline_mode = #tpu.pipeline_mode<synchronous>, transform_indices = @transform_1, window_bounds = array<i64: 16, 128>}, {pipeline_mode = #tpu.pipeline_mode<synchronous>, transform_indices = @transform_2, window_bounds = array<i64: 128, 128>}, {pipeline_mode = #tpu.pipeline_mode<synchronous>, transform_indices = @transform_3, window_bounds = array<i64: 8, 128>}, {transform_indices = @transform_4, window_bounds = array<i64: 4, 8, 128>}]} {
    %c0 = arith.constant 0 : index
    %c0_0 = arith.constant 0 : index
    %c0_1 = arith.constant 0 : index
    %0 = vector.load %arg1[%c0, %c0_0, %c0_1] : memref<4x8x16xf32, #tpu.memory_space<vmem>>, vector<4x8x16xf32>
    %1 = vector.shape_cast %0 : vector<4x8x16xf32> to vector<32x16xf32>
    %c0_2 = arith.constant 0 : index
    %c0_3 = arith.constant 0 : index
    %2 = vector.load %arg4[%c0_2, %c0_3] : memref<8x128xf32, #tpu.memory_space<vmem>>, vector<1x128xf32>
    %c1 = arith.constant 1 : index
    %c0_4 = arith.constant 0 : index
    %3 = vector.load %arg4[%c1, %c0_4] : memref<8x128xf32, #tpu.memory_space<vmem>>, vector<1x128xf32>
    %c2 = arith.constant 2 : index
    %c0_5 = arith.constant 0 : index
    %4 = vector.load %arg4[%c2, %c0_5] : memref<8x128xf32, #tpu.memory_space<vmem>>, vector<1x128xf32>
    %c3 = arith.constant 3 : index
    %c0_6 = arith.constant 0 : index
    %5 = vector.load %arg4[%c3, %c0_6] : memref<8x128xf32, #tpu.memory_space<vmem>>, vector<1x128xf32>
    %c0_7 = arith.constant 0 : index
    %c0_8 = arith.constant 0 : index
    %6 = vector.load %arg2[%c0_7, %c0_8] : memref<16x128xf32, #tpu.memory_space<vmem>>, vector<16x128xf32>
    %cst = arith.constant dense<0.000000e+00> : vector<32x128xf32>
    %7 = tpu.matmul %1, %6, %cst {dimension_numbers = #tpu.dot_dimension_numbers<[1], [0], [0], [1], [0, 0, 1, 1], [], []>} : vector<32x16xf32>, vector<16x128xf32>, vector<32x128xf32> -> vector<32x128xf32>
    %8 = vector.shape_cast %7 : vector<32x128xf32> to vector<4x8x128xf32>
    %cst_9 = arith.constant dense<0.000000e+00> : vector<4x128xf32>
    %9 = vector.multi_reduction <add>, %8, %cst_9 [1] : vector<4x8x128xf32> to vector<4x128xf32>
    %10 = vector.shape_cast %9 : vector<4x128xf32> to vector<4x1x128xf32>
    %cst_10 = arith.constant 1.250000e-01 : f32
    %11 = vector.broadcast %cst_10 : f32 to vector<4x1x128xf32>
    %12 = arith.mulf %10, %11 : vector<4x1x128xf32>
    %13 = arith.mulf %8, %8 : vector<4x8x128xf32>
    %cst_11 = arith.constant dense<0.000000e+00> : vector<4x128xf32>
    %14 = vector.multi_reduction <add>, %13, %cst_11 [1] : vector<4x8x128xf32> to vector<4x128xf32>
    %15 = vector.shape_cast %14 : vector<4x128xf32> to vector<4x1x128xf32>
    %cst_12 = arith.constant 1.250000e-01 : f32
    %16 = vector.broadcast %cst_12 : f32 to vector<4x1x128xf32>
    %17 = arith.mulf %15, %16 : vector<4x1x128xf32>
    %18 = arith.mulf %12, %12 : vector<4x1x128xf32>
    %19 = arith.subf %17, %18 : vector<4x1x128xf32>
    %cst_13 = arith.constant 0.000000e+00 : f32
    %20 = vector.broadcast %cst_13 : f32 to vector<4x1x128xf32>
    %21 = arith.maximumf %19, %20 : vector<4x1x128xf32>
    %cst_14 = arith.constant 9.99999974E-6 : f32
    %22 = vector.broadcast %cst_14 : f32 to vector<4x1x128xf32>
    %23 = arith.addf %21, %22 : vector<4x1x128xf32>
    %24 = math.rsqrt %23 : vector<4x1x128xf32>
    %25 = vector.shape_cast %2 : vector<1x128xf32> to vector<1x1x128xf32>
    %26 = vector.broadcast %25 : vector<1x1x128xf32> to vector<4x1x128xf32>
    %27 = arith.mulf %26, %24 : vector<4x1x128xf32>
    %28 = arith.mulf %12, %27 : vector<4x1x128xf32>
    %29 = vector.shape_cast %3 : vector<1x128xf32> to vector<1x1x128xf32>
    %30 = vector.broadcast %29 : vector<1x1x128xf32> to vector<4x1x128xf32>
    %31 = arith.subf %30, %28 : vector<4x1x128xf32>
    %32 = vector.broadcast %27 : vector<4x1x128xf32> to vector<4x8x128xf32>
    %33 = arith.mulf %8, %32 : vector<4x8x128xf32>
    %34 = vector.broadcast %31 : vector<4x1x128xf32> to vector<4x8x128xf32>
    %35 = arith.addf %33, %34 : vector<4x8x128xf32>
    %cst_15 = arith.constant 0.00999999977 : f32
    %36 = vector.broadcast %cst_15 : f32 to vector<4x8x128xf32>
    %37 = arith.mulf %36, %35 : vector<4x8x128xf32>
    %38 = arith.maximumf %35, %37 : vector<4x8x128xf32>
    %39 = vector.shape_cast %38 : vector<4x8x128xf32> to vector<32x128xf32>
    %c0_16 = arith.constant 0 : index
    %c0_17 = arith.constant 0 : index
    %40 = vector.load %arg3[%c0_16, %c0_17] : memref<128x128xf32, #tpu.memory_space<vmem>>, vector<128x128xf32>
    %cst_18 = arith.constant dense<0.000000e+00> : vector<32x128xf32>
    %41 = tpu.matmul %39, %40, %cst_18 {dimension_numbers = #tpu.dot_dimension_numbers<[1], [0], [0], [1], [0, 0, 1, 1], [], []>} : vector<32x128xf32>, vector<128x128xf32>, vector<32x128xf32> -> vector<32x128xf32>
    %42 = vector.shape_cast %41 : vector<32x128xf32> to vector<4x8x128xf32>
    %cst_19 = arith.constant dense<0.000000e+00> : vector<4x128xf32>
    %43 = vector.multi_reduction <add>, %42, %cst_19 [1] : vector<4x8x128xf32> to vector<4x128xf32>
    %44 = vector.shape_cast %43 : vector<4x128xf32> to vector<4x1x128xf32>
    %cst_20 = arith.constant 1.250000e-01 : f32
    %45 = vector.broadcast %cst_20 : f32 to vector<4x1x128xf32>
    %46 = arith.mulf %44, %45 : vector<4x1x128xf32>
    %47 = arith.mulf %42, %42 : vector<4x8x128xf32>
    %cst_21 = arith.constant dense<0.000000e+00> : vector<4x128xf32>
    %48 = vector.multi_reduction <add>, %47, %cst_21 [1] : vector<4x8x128xf32> to vector<4x128xf32>
    %49 = vector.shape_cast %48 : vector<4x128xf32> to vector<4x1x128xf32>
    %cst_22 = arith.constant 1.250000e-01 : f32
    %50 = vector.broadcast %cst_22 : f32 to vector<4x1x128xf32>
    %51 = arith.mulf %49, %50 : vector<4x1x128xf32>
    %52 = arith.mulf %46, %46 : vector<4x1x128xf32>
    %53 = arith.subf %51, %52 : vector<4x1x128xf32>
    %cst_23 = arith.constant 0.000000e+00 : f32
    %54 = vector.broadcast %cst_23 : f32 to vector<4x1x128xf32>
    %55 = arith.maximumf %53, %54 : vector<4x1x128xf32>
    %cst_24 = arith.constant 9.99999974E-6 : f32
    %56 = vector.broadcast %cst_24 : f32 to vector<4x1x128xf32>
    %57 = arith.addf %55, %56 : vector<4x1x128xf32>
    %58 = math.rsqrt %57 : vector<4x1x128xf32>
    %59 = vector.shape_cast %4 : vector<1x128xf32> to vector<1x1x128xf32>
    %60 = vector.broadcast %59 : vector<1x1x128xf32> to vector<4x1x128xf32>
    %61 = arith.mulf %60, %58 : vector<4x1x128xf32>
    %62 = arith.mulf %46, %61 : vector<4x1x128xf32>
    %63 = vector.shape_cast %5 : vector<1x128xf32> to vector<1x1x128xf32>
    %64 = vector.broadcast %63 : vector<1x1x128xf32> to vector<4x1x128xf32>
    %65 = arith.subf %64, %62 : vector<4x1x128xf32>
    %66 = vector.broadcast %61 : vector<4x1x128xf32> to vector<4x8x128xf32>
    %67 = arith.mulf %42, %66 : vector<4x8x128xf32>
    %68 = vector.broadcast %65 : vector<4x1x128xf32> to vector<4x8x128xf32>
    %69 = arith.addf %67, %68 : vector<4x8x128xf32>
    %cst_25 = arith.constant 0.00999999977 : f32
    %70 = vector.broadcast %cst_25 : f32 to vector<4x8x128xf32>
    %71 = arith.mulf %70, %69 : vector<4x8x128xf32>
    %72 = arith.maximumf %69, %71 : vector<4x8x128xf32>
    %73 = vector.shape_cast %72 : vector<4x8x128xf32> to vector<32x128xf32>
    %74 = vector.shape_cast %73 : vector<32x128xf32> to vector<4x8x128xf32>
    %c0_26 = arith.constant 0 : index
    %c0_27 = arith.constant 0 : index
    %c0_28 = arith.constant 0 : index
    %75 = vector.load %arg5[%c0_26, %c0_27, %c0_28] : memref<4x8x128xf32, #tpu.memory_space<vmem>>, vector<4x8x128xf32>
    tpu.vector_store %arg5[%c0_26, %c0_27, %c0_28], %74 {strides = array<i32>} : memref<4x8x128xf32, #tpu.memory_space<vmem>>, vector<4x8x128xf32>,
    return
  }
  func.func @transform_0(%arg0: i32) -> (i32, i32, i32) {
    %c0_i32 = arith.constant 0 : i32
    %c0_i32_0 = arith.constant 0 : i32
    %c0_i32_1 = arith.constant 0 : i32
    return %arg0, %c0_i32, %c0_i32_0 : i32, i32, i32
  }
  func.func @transform_1(%arg0: i32) -> (i32, i32) {
    %c0_i32 = arith.constant 0 : i32
    %c0_i32_0 = arith.constant 0 : i32
    %c0_i32_1 = arith.constant 0 : i32
    return %c0_i32, %c0_i32_0 : i32, i32
  }
  func.func @transform_2(%arg0: i32) -> (i32, i32) {
    %c0_i32 = arith.constant 0 : i32
    %c0_i32_0 = arith.constant 0 : i32
    %c0_i32_1 = arith.constant 0 : i32
    return %c0_i32, %c0_i32_0 : i32, i32
  }
  func.func @transform_3(%arg0: i32) -> (i32, i32) {
    %c0_i32 = arith.constant 0 : i32
    %c0_i32_0 = arith.constant 0 : i32
    %c0_i32_1 = arith.constant 0 : i32
    return %c0_i32, %c0_i32_0 : i32, i32
  }
  func.func @transform_4(%arg0: i32) -> (i32, i32, i32) {
    %c0_i32 = arith.constant 0 : i32
    %c0_i32_0 = arith.constant 0 : i32
    %c0_i32_1 = arith.constant 0 : i32
    return %arg0, %c0_i32, %c0_i32_0 : i32, i32, i32
  }
}

</mosaic_0001>

<bundles_post_ra>
// kernel: tpu_custom_call.1
= control target key start
LH: loop header
LB: loop body
LE: loop exit
PB: predicated region body
PF: predicated region fallthrough
CT: control target
= control target key end

     0   :  { %9 = vsyncpa [#allocation3], 0  ;;  %s1567_s0 = inlined_call_operand.hbm [shape: f32[8,8,16], index: 0, kind: input, shape index: {}]   ;;  %s1568_s1 = inlined_call_operand.hbm [shape: f32[16,128], index: 1, kind: input, shape index: {}]   ;;  %s1569_s2 = inlined_call_operand.hbm [shape: f32[128,128], index: 2, kind: input, shape index: {}]   ;;  %s1570_s3 = inlined_call_operand.hbm [shape: f32[8,128], index: 3, kind: input, shape index: {}]   ;;  %s1571_s4 = inlined_call_operand.hbm [shape: f32[8,8,128], index: 4, kind: output, shape index: {}]  }
   0x1   :  { %11 = vsyncpa [#allocation3 + $0x1], 0 }
   0x2   :  { %12 = vsyncpa [#allocation6], 0 }
   0x3   :  { %13 = vsyncpa [#allocation9], 0 }
   0x4   :  { %14 = vsyncpa [#allocation4], 0 }
   0x5   :  { %16 = vsyncpa [#allocation4 + $0x1], 0  ;;  %s1280_s15 = smov 0   ;;  %s1282_s16 = smov 0  }
   0x6   :  { %s1284_s17 = smov 0   ;;  %s1286_s18 = smov 0  }
   0x7 LB: > { %s1301_s19 = sadd.s32 4294967295, %s1244_s18   ;;  %s869_s20 = sadd.s32 4294967294, %s1244_s18   ;;  %s1244_s18 = sphi %s1286_s18, %s1594_s18   ;;  %s1240_s17 = sphi %s1284_s17, %s1593_s17   ;;  %s1236_s16 = sphi %s1282_s16, %s1592_s16   ;;  %s1232_s15 = sphi %s1280_s15, %s1591_s15  }
   0x8   : > { %p42_p0 = scmp.ne.s32.totalorder %s1236_s16, %s1232_s15  ;;  %p1572_p1 = scmp.eq.s32.totalorder %s1301_s19, 0 }
   0x9   : > { %p129_p2 = scmp.eq.s32.totalorder %s1301_s19, 1  ;;  %p135_p3 = scmp.eq.s32.totalorder %s869_s20, 1 }
   0xa   : > { %p1310_p4 = por %p1572_p1, %p42_p0  ;;  %p870_p5 = scmp.ge.s32.totalorder %s1244_s18, 1 }
   0xb   : > { %p1315_p6 = por %p135_p3, %p42_p0  ;;  %p142_p7 = scmp.lt.s32.totalorder %s1244_s18, 3 }
   0xc   : > { %s1576_s21 = scalar_select %p1310_p4, 1, 0 }
   0xd   : > { %s1577_s22 = scalar_select %p1315_p6, 1, 0 }
   0xe   : > { %p1320_p8 = pnand %p870_p5, %p142_p7  ;;  %s1246_s24 = smov [#allocation5]  }
   0xf   : > { %s154_s25 = sshll.u32 %s1246_s24, 4  ;;  %s1247_s27 = smov [#allocation7]   ;;  %s155_s25 = int_to_ptr.vmem [resolvable:$true] %s154_s25 }
  0x10   : > { %s1578_s23 = scalar_select %p1320_p8, 1, 0 }
  0x11   : > { %p985_p9 = pneg %p1320_p8  ;;  %s167_s28 = sshll.u32 %s1247_s27, 4  ;;  %s168_s28 = int_to_ptr.vmem [resolvable:$true] %s167_s28 }
  0x12   : > { %s1248_s29 = smov [#allocation8]   ;;  %s1077_s5 = scalar_lea.vmem %s155_s25, 256 }
  0x13   : > { %p1329_p11 = pnand %p985_p9, %p1572_p1  ;;  %s181_s30 = sshll.u32 %s1248_s29, 4  ;;  %s182_s30 = int_to_ptr.vmem [resolvable:$true] %s181_s30 }
  0x14   : > { %p1078_p13 = scmp.ne.s32.totalorder %s155_s25, %s1077_s5  ;;  %p1085_p5 = scmp.lt.s32.totalorder %s155_s25, %s155_s25 }
  0x15   : > { %p1068_p12 = pneg %p1329_p11  ;;  %p1086_p7 = scmp.lt.s32.totalorder %s1077_s5, %s1077_s5 }
  0x17   : > { %p1080_p0 = pnand %p1078_p13, %p1068_p12  ;;  %p1087_p9 = por %p1086_p7, %p1085_p5 }
  0x19   : > { %p1081_p3 = pneg %p1080_p0 }
  0x1b   : > { %p1088_p10 = pnand %p1087_p9, %p1081_p3 }
  0x1d   : > { %1091 = shalt.err (!%p1088_p10)
}
  0x1e   : > { %s1249_s6 = smov 128   ;;  %s1250_s7 = smov 8  }
  0x1f   : > { %988 = dma.hbm_to_vmem [thread:$0]  (!%p1329_p11), %s1568_s1, 256, %s155_s25, [#allocation6], %s1249_s6, %s1249_s6, %s1250_s7  }
  0x20   : > { %s1103_s10 = scalar_lea.vmem %s168_s28, 2048  ;;  %p1111_p3 = scmp.lt.s32.totalorder %s168_s28, %s168_s28 }
  0x21   : > { %p1104_p13 = scmp.ne.s32.totalorder %s168_s28, %s1103_s10  ;;  %p1112_p10 = scmp.lt.s32.totalorder %s1103_s10, %s1103_s10 }
  0x23   : > { %p1106_p0 = pnand %p1104_p13, %p1068_p12  ;;  %p1113_p7 = por %p1112_p10, %p1111_p3 }
  0x25   : > { %p1107_p5 = pneg %p1106_p0 }
  0x27   : > { %p1114_p9 = pnand %p1113_p7, %p1107_p5 }
  0x29   : > { %1117 = shalt.err (!%p1114_p9)
}
  0x2a   : > { %991 = dma.hbm_to_vmem [thread:$0]  (!%p1329_p11), %s1569_s2, 2048, %s168_s28, [#allocation6], %s1249_s6, %s1249_s6, %s1250_s7  }
  0x2b   : > { %s1129_s13 = scalar_lea.vmem %s182_s30, 128  ;;  %p1137_p3 = scmp.lt.s32.totalorder %s182_s30, %s182_s30 }
  0x2c   : > { %p1130_p1 = scmp.ne.s32.totalorder %s182_s30, %s1129_s13  ;;  %p1138_p5 = scmp.lt.s32.totalorder %s1129_s13, %s1129_s13 }
  0x2e   : > { %p1132_p13 = pnand %p1130_p1, %p1068_p12  ;;  %p1139_p10 = por %p1138_p5, %p1137_p3 }
  0x30   : > { %p1133_p0 = pneg %p1132_p13 }
  0x32   : > { %p1140_p7 = pnand %p1139_p10, %p1133_p0 }
  0x34   : > { %1143 = shalt.err (!%p1140_p7)
}
  0x35   : > { %994 = dma.hbm_to_vmem [thread:$0]  (!%p1329_p11), %s1570_s3, 128, %s182_s30, [#allocation9]  }
  0x36   : > { %s1366_s24 = sadd.s32 1, %s1244_s18   ;;  %s29_s26 = sadd.s32 1, %s1240_s17 }
  0x37   : > { %s26_s25 = ssub.s32 %s1244_s18, %s1366_s24  ;;  %p36_p12 = scmp.ne.s32.totalorder %s1240_s17, %s1236_s16 }
  0x38   : > { %p27_p1 = scmp.eq.s32.totalorder %s26_s25, 0  ;;  %p37_p9 = scmp.eq.s32.totalorder %s1244_s18, 0 }
  0x39   : > { %p1006_p13 = scmp.lt.s32.totalorder %s1244_s18, 2  ;;  %p1380_p3 = por %p129_p2, %p36_p12 }
  0x3a   : > { %s1376_s27 = scalar_select %p27_p1, %s1240_s17, %s29_s26  }
  0x3b   : > { %p38_p0 = por %p37_p9, %p36_p12  ;;  %s192_s29 = sand.u32 1, %s1240_s17  }
  0x3c   : > { %s1580_s28 = scalar_select %p1380_p3, 1, 0 }
  0x3d   : > { %s893_s5 = sshll.u32 %s1244_s18, 9  ;;  %s875_s30 = sshll.u32 %s192_s29, 5 }
  0x3e   : > { %s1389_s10 = scalar_lea.hbm %s1567_s0, %s893_s5  ;;  %s196_s11 = scalar_lea.vmem [#allocation2], %s875_s30 }
  0x3f   : > { %s203_s12 = sshll.u32 %s196_s11, 4  ;;  %p1391_p11 = pnand %p1006_p13, %p38_p0  ;;  %s1395_s12 = int_to_ptr.vmem [resolvable:$true] %s203_s12 }
  0x40   : > { %s1397_s14 = scalar_lea.sflag [#allocation3], %s192_s29  ;;  %s1144_s20 = scalar_lea.hbm %s1389_s10, 512 }
  0x41   : > { %p1145_p2 = scmp.ne.s32.totalorder %s1389_s10, %s1144_s20  ;;  %p1146_p5 = pneg %p1391_p11 }
  0x42   : > { %s1149_s5 = scalar_lea.hbm %s1567_s0, 1024  ;;  %p1150_p1 = scmp.lt.s32.totalorder %s1389_s10, %s1567_s0 }
  0x43   : > { %p1147_p10 = pnand %p1146_p5, %p1145_p2  ;;  %p1151_p12 = scmp.lt.s32.totalorder %s1149_s5, %s1144_s20 }
  0x45   : > { %p1148_p7 = pneg %p1147_p10  ;;  %p1152_p9 = por %p1151_p12, %p1150_p1 }
  0x47   : > { %p1153_p13 = pnand %p1152_p9, %p1148_p7 }
  0x49   : > { %1156 = shalt.err (!%p1153_p13)
}
  0x4a   : > { %s1157_s29 = scalar_lea.vmem %s1395_s12, 512  ;;  %s1251_s9 = smov [#allocation2]  }
  0x4b   : > { %p1158_p0 = scmp.ne.s32.totalorder %s1395_s12, %s1157_s29  ;;  %s1162_s11 = sshll.u32 %s1251_s9, 4  ;;  %s1163_s11 = int_to_ptr.vmem [resolvable:$false] %s1162_s11 }
  0x4c   : > { %s1164_s25 = scalar_lea.vmem %s1163_s11, 1024  ;;  %p1165_p10 = scmp.lt.s32.totalorder %s1395_s12, %s1163_s11 }
  0x4d   : > { %p1160_p6 = pnand %p1158_p0, %p1146_p5  ;;  %p1166_p3 = scmp.lt.s32.totalorder %s1164_s25, %s1157_s29 }
  0x4f   : > { %p1161_p2 = pneg %p1160_p6  ;;  %p1167_p4 = por %p1166_p3, %p1165_p10 }
  0x51   : > { %p1168_p8 = pnand %p1167_p4, %p1161_p2 }
  0x53   : > { %1171 = shalt.err (!%p1168_p8)
}
  0x54   : > { %998 = dma.hbm_to_vmem [thread:$0]  (!%p1391_p11), %s1389_s10, 512, %s1395_s12, %s1397_s14, %s1249_s6, %s1249_s6, %s1250_s7  }
  0x55   : > { %p1582_p6 = scmp.ne.s32.totalorder %s1578_s23, 0 }
  0x56   : > { %s1424_s20 = sand.u32 (!%p1582_p6), 1, %s1236_s16   ;;  %p1583_p4 = scmp.ne.s32.totalorder (!%p1582_p6), %s1576_s21, 0 }
  0x57   : > { %215 = sbr.rel (%p1582_p6) target bundleno = 615 (0x267), region = 36  ;;  %s879_s26 = sshll.u32 (!%p1582_p6), %s1424_s20, 5 }
  0x58   : > { %s218_s5 = scalar_lea.sflag (!%p1582_p6), [#allocation3], %s1424_s20  ;;  %s221_s13 = scalar_lea.vmem (!%p1582_p6), [#allocation2], %s879_s26 }
  0x5c   : > { %1215 = dma.done.wait (%p1583_p4), %s218_s5, 512  }
  0x5d   : > { %1217 = vsyncadd (%p1583_p4), %s218_s5, 4294966784  ;;  %p1584_p8 = scmp.eq.s32.totalorder %s1301_s19, 0 }
  0x5f   : > { %1219 = dma.done.wait (%p1584_p8), [#allocation6], 2304   ;;  %p1585_p3 = pmov %p1584_p8 }
  0x61   : > { %1221 = vsyncadd (%p1585_p3), [#allocation6], 4294964992  ;;  %p1586_p11 = pmov %p1585_p3 }
  0x62   : > { %p1587_p5 = pmov %p1585_p3 }
  0x63   : > { %1223 = dma.done.wait (%p1586_p11), [#allocation9], 128  }
  0x64   : > { %1225 = vsyncadd (%p1587_p5), [#allocation9], 4294967168  ;;  %vm270_vm0 = vcmask 130048   ;;  %v269_v0 = vld [vmem:[#allocation5 + $0x8] sm:$0xff]  ;;  %v268_v1 = vld [vmem:[#allocation5] sm:$0xff]  ;;  %s257_s21 = scalar_lea.vmem [#allocation10], %s879_s26 }
  0x65   : > { %v260_v2 = vld [vmem:[%s221_s13] sm:$0xff]  ;;  %921 = vmatprep.subr.mxu0 %v269_v0  ;;  %v261_v3 = vld [vmem:[%s221_s13 + $0x8] sm:$0xff]  ;;  %v262_v4 = vld [vmem:[%s221_s13 + $0x10] sm:$0xff]  ;;  %s894_s23 = sshll.u32 %s1301_s19, 9  ;;  %s767_s6 = sshll.u32 %s257_s21, 4  ;;  %s1524_s6 = int_to_ptr.vmem [resolvable:$true] %s767_s6 }
  0x66   : > { %925 = vmatprep.mubr.msk.f32.mxu0 %vm270_vm0, %v260_v2  ;;  %922 = vmatpush3.msra.mxu0 %v269_v0  ;;  %v263_v5 = vld [vmem:[%s221_s13 + $0x18] sm:$0xff]  ;;  %v523_v6 = vld [vmem:[#allocation7 + $0x78] sm:$0xff]  ;;  %v522_v7 = vld [vmem:[#allocation7 + $0x70] sm:$0xff]  ;;  %s1522_s12 = scalar_lea.hbm %s1571_s4, %s894_s23  ;;  %s754_s14 = scalar_lea.sflag [#allocation4], %s1424_s20 }
  0x67   : > { %923 = vmatprep.subr.mxu0 %v268_v1  ;;  %931 = vmatprep.subr.mxu1 %v523_v6  ;;  %v521_v8 = vld [vmem:[#allocation7 + $0x68] sm:$0xff]  ;;  %v520_v9 = vld [vmem:[#allocation7 + $0x60] sm:$0xff]  ;;  %v519_v10 = vld [vmem:[#allocation7 + $0x58] sm:$0xff]  ;;  %s1172_s30 = scalar_lea.vmem %s1524_s6, 512  ;;  %p1588_p1 = scmp.ne.s32.totalorder %s1580_s28, 0 }
  0x68   : > { %924 = vmatpush3.msra.mxu0 %v268_v1  ;;  %932 = vmatpush3.msra.mxu1 %v523_v6  ;;  %v518_v11 = vld [vmem:[#allocation7 + $0x50] sm:$0xff]  ;;  %v517_v12 = vld [vmem:[#allocation7 + $0x48] sm:$0xff]  ;;  %v516_v13 = vld [vmem:[#allocation7 + $0x40] sm:$0xff]  ;;  %p1173_p7 = scmp.ne.s32.totalorder %s1524_s6, %s1172_s30  ;;  %s1252_s19 = smov [#allocation10]  }
  0x69   : > { %926 = vmatmul.mubr.msk.f32.vlgmr.msra.gmra.mxu0 %vm270_vm0, %v261_v3  ;;  %933 = vmatprep.subr.mxu1 %v522_v7  ;;  %v515_v14 = vld [vmem:[#allocation7 + $0x38] sm:$0xff]  ;;  %v514_v15 = vld [vmem:[#allocation7 + $0x30] sm:$0xff]  ;;  %v513_v16 = vld [vmem:[#allocation7 + $0x28] sm:$0xff]  ;;  %s1176_s8 = sshll.u32 %s1252_s19, 4  ;;  %s1177_s8 = int_to_ptr.vmem [resolvable:$false] %s1176_s8 }
  0x6a   : > { %928 = vmatprep.mubr.msk.f32.mxu0 %vm270_vm0, %v262_v4  ;;  %934 = vmatpush3.msra.mxu1 %v522_v7  ;;  %v512_v17 = vld [vmem:[#allocation7 + $0x20] sm:$0xff]  ;;  %v511_v18 = vld [vmem:[#allocation7 + $0x18] sm:$0xff]  ;;  %v510_v19 = vld [vmem:[#allocation7 + $0x10] sm:$0xff]  ;;  %p1174_p12 = pnand %p1173_p7, %p1588_p1  ;;  %s1178_s29 = scalar_lea.vmem %s1177_s8, 1024 }
  0x6b   : > { %935 = vmatprep.subr.mxu1 %v521_v8  ;;  %v509_v20 = vld [vmem:[#allocation7 + $0x8] sm:$0xff]  ;;  %v508_v21 = vld [vmem:[#allocation7] sm:$0xff]  ;;  %p1179_p13 = scmp.lt.s32.totalorder %s1524_s6, %s1177_s8  ;;  %p1180_p0 = scmp.lt.s32.totalorder %s1178_s29, %s1172_s30 }
  0x6c   : > { %936 = vmatpush3.msra.mxu1 %v521_v8  ;;  %p1175_p9 = pneg %p1174_p12 }
  0x6d   : > { %929 = vmatmul.mubr.msk.f32.gmra.mxu0 %vm270_vm0, %v263_v5  ;;  %937 = vmatprep.subr.mxu1 %v520_v9  ;;  %p1181_p2 = por %p1180_p0, %p1179_p13 }
  0x6e   : > { %938 = vmatpush3.msra.mxu1 %v520_v9 }
  0x6f   : > { %939 = vmatprep.subr.mxu1 %v519_v10  ;;  %p1182_p10 = pnand %p1181_p2, %p1175_p9 }
  0x70   : > { %940 = vmatpush3.msra.mxu1 %v519_v10 }
  0x71   : > { %941 = vmatprep.subr.mxu1 %v518_v11 }
  0x72   : > { %942 = vmatpush3.msra.mxu1 %v518_v11 }
  0x73   : > { %943 = vmatprep.subr.mxu1 %v517_v12 }
  0x74   : > { %944 = vmatpush3.msra.mxu1 %v517_v12 }
  0x75   : > { %945 = vmatprep.subr.mxu1 %v516_v13 }
  0x76   : > { %946 = vmatpush3.msra.mxu1 %v516_v13 }
  0x77   : > { %947 = vmatprep.subr.mxu1 %v515_v14 }
  0x78   : > { %948 = vmatpush3.msra.mxu1 %v515_v14 }
  0x79   : > { %949 = vmatprep.subr.mxu1 %v514_v15 }
  0x7a   : > { %950 = vmatpush3.msra.mxu1 %v514_v15 }
  0x7b   : > { %951 = vmatprep.subr.mxu1 %v513_v16 }
  0x7c   : > { %952 = vmatpush3.msra.mxu1 %v513_v16 }
  0x7d   : > { %953 = vmatprep.subr.mxu1 %v512_v17 }
  0x7e   : > { %954 = vmatpush3.msra.mxu1 %v512_v17 }
  0x7f   : > { %955 = vmatprep.subr.mxu1 %v511_v18 }
  0x80   : > { %956 = vmatpush3.msra.mxu1 %v511_v18 }
  0x81   : > { %957 = vmatprep.subr.mxu1 %v510_v19 }
  0x82   : > { %958 = vmatpush3.msra.mxu1 %v510_v19 }
  0x83   : > { %959 = vmatprep.subr.mxu1 %v509_v20 }
  0x84   : > { %960 = vmatpush3.msra.mxu1 %v509_v20 }
  0x85   : > { %961 = vmatprep.subr.mxu1 %v508_v21 }
  0x86   : > { %962 = vmatpush3.msra.mxu1 %v508_v21 }
 0x129   : > { %v1442_v22 = vpop.f32.mrf.mxu0 }
 0x12a   : > { %v374_v23 = vrot.slane %v1442_v22, 4  ;;  %v397_v24 = vmul.f32 %v1442_v22, %v1442_v22 }
 0x12b   : > { %v1447_v25 = vpop.f32.mrf.mxu0 }
 0x12c   : > { %v375_v26 = vadd.f32 %v1442_v22, %v374_v23  ;;  %v406_v27 = vrot.slane %v397_v24, 4  ;;  %v368_v28 = vrot.slane %v1447_v25, 4  ;;  %v396_v29 = vmul.f32 %v1447_v25, %v1447_v25 }
 0x12d   : > { %v1453_v30 = vpop.f32.mrf.mxu0 }
 0x12e   : > { %v376_v31 = vrot.slane %v375_v26, 2  ;;  %v407_v32 = vadd.f32 %v406_v27, %v397_v24  ;;  %v369_v33 = vadd.f32 %v368_v28, %v1447_v25  ;;  %v400_v34 = vrot.slane %v396_v29, 4 }
 0x12f   : > { %v386_v35 = vrot.slane %v1453_v30, 4  ;;  %v399_v36 = vmul.f32 %v1453_v30, %v1453_v30  ;;  %v1459_v37 = vpop.f32.mrf.mxu0 }
 0x130   : > { %v377_v38 = vadd.f32 %v376_v31, %v375_v26  ;;  %v408_v39 = vrot.slane %v407_v32, 2  ;;  %v370_v40 = vrot.slane %v369_v33, 2  ;;  %v401_v41 = vadd.f32 %v400_v34, %v396_v29 }
 0x131   : > { %v387_v42 = vadd.f32 %v1453_v30, %v386_v35  ;;  %v418_v43 = vrot.slane %v399_v36, 4  ;;  %v380_v44 = vrot.slane %v1459_v37, 4  ;;  %v398_v45 = vmul.f32 %v1459_v37, %v1459_v37 }
 0x132   : > { %v378_v46 = vrot.slane %v377_v38, 1  ;;  %v409_v47 = vadd.f32 %v408_v39, %v407_v32  ;;  %v371_v48 = vadd.f32 %v370_v40, %v369_v33  ;;  %v402_v49 = vrot.slane %v401_v41, 2 }
 0x133   : > { %v388_v50 = vrot.slane %v387_v42, 2  ;;  %v419_v51 = vadd.f32 %v418_v43, %v399_v36  ;;  %v381_v52 = vadd.f32 %v380_v44, %v1459_v37  ;;  %v412_v53 = vrot.slane %v398_v45, 4  ;;  %v264_v44 = vld [vmem:[#allocation8] sm:$0x1] }
 0x134   : > { %v379_v54 = vadd.f32 %v378_v46, %v377_v38  ;;  %v410_v55 = vrot.slane %v409_v47, 1  ;;  %v372_v56 = vrot.slane %v371_v48, 1  ;;  %v403_v57 = vadd.f32 %v402_v49, %v401_v41  ;;  %v265_v49 = vld [vmem:[#allocation8 + $0x1] sm:$0x1] }
 0x135   : > { %v389_v58 = vadd.f32 %v388_v50, %v387_v42  ;;  %v420_v59 = vrot.slane %v419_v51, 2  ;;  %v382_v60 = vrot.slane %v381_v52, 2  ;;  %v413_v61 = vadd.f32 %v412_v53, %v398_v45 }
 0x136   : > { %v393_v62 = vmul.f32 0.125, %v379_v54  ;;  %v411_v63 = vadd.f32 %v410_v55, %v409_v47  ;;  %v373_v0 = vadd.f32 %v372_v56, %v371_v48  ;;  %v404_v1 = vrot.slane %v403_v57, 1 }
 0x137   : > { %v390_v2 = vrot.slane %v389_v58, 1  ;;  %v421_v3 = vadd.f32 %v420_v59, %v419_v51  ;;  %v383_v4 = vadd.f32 %v382_v60, %v381_v52  ;;  %v414_v5 = vrot.slane %v413_v61, 2 }
 0x138   : > { %v425_v6 = vmul.f32 0.125, %v411_v63  ;;  %v429_v7 = vmul.f32 %v393_v62, %v393_v62  ;;  %v405_v8 = vadd.f32 %v404_v1, %v403_v57  ;;  %v392_v9 = vmul.f32 0.125, %v373_v0 }
 0x139   : > { %v391_v10 = vadd.f32 %v390_v2, %v389_v58  ;;  %v422_v11 = vrot.slane %v421_v3, 1  ;;  %v384_v12 = vrot.slane %v383_v4, 1  ;;  %v415_v13 = vadd.f32 %v414_v5, %v413_v61 }
 0x13a   : > { %v433_v14 = vsub.f32 %v425_v6, %v429_v7  ;;  %v424_v15 = vmul.f32 0.125, %v405_v8  ;;  %v428_v16 = vmul.f32 %v392_v9, %v392_v9  ;;  %v460_v41 = vlaneseq }
 0x13b   : > { %v395_v17 = vmul.f32 0.125, %v391_v10  ;;  %v423_v18 = vadd.f32 %v422_v11, %v421_v3  ;;  %v385_v19 = vadd.f32 %v384_v12, %v383_v4  ;;  %v416_v20 = vrot.slane %v415_v13, 1 }
 0x13c   : > { %v437_v21 = vmax.f32 %v433_v14, 0.0  ;;  %v432_v23 = vsub.f32 %v424_v15, %v428_v16  ;;  %v461_v43 = vshrl.u32 %v460_v41, 7 }
 0x13d   : > { %v427_v24 = vmul.f32 0.125, %v423_v18  ;;  %v431_v26 = vmul.f32 %v395_v17, %v395_v17  ;;  %v394_v27 = vmul.f32 0.125, %v385_v19  ;;  %v417_v28 = vadd.f32 %v416_v20, %v415_v13 }
 0x13e   : > { %v441_v29 = vadd.f32 1e-05, %v437_v21  ;;  %v436_v31 = vmax.f32 %v432_v23, 0.0  ;;  %v1466_v45 = vsub.s32 0, %v461_v43 }
 0x13f   : > { %v435_v32 = vsub.f32 %v427_v24, %v431_v26  ;;  %v426_v33 = vmul.f32 0.125, %v417_v28  ;;  %v430_v34 = vmul.f32 %v394_v27, %v394_v27 }
 0x140   : > { %1050 = vrsqrt.f32 %v441_v29  ;;  %v440_v35 = vadd.f32 1e-05, %v436_v31 }
 0x141   : > { %v439_v36 = vmax.f32 %v435_v32, 0.0  ;;  %v434_v38 = vsub.f32 %v426_v33, %v430_v34 }
 0x142   : > { %1052 = vrsqrt.f32 %v440_v35 }
 0x143   : > { %v443_v39 = vadd.f32 1e-05, %v439_v36  ;;  %v438_v40 = vmax.f32 %v434_v38, 0.0 }
 0x145   : > { %1054 = vrsqrt.f32 %v443_v39  ;;  %v442_v42 = vadd.f32 1e-05, %v438_v40 }
 0x147   : > { %1056 = vrsqrt.f32 %v442_v42 }
 0x14d   : > { %v1051_v46 = vpop.eup %1050 }
 0x14e   : > { %v449_v47 = vmul.f32 %v1051_v46, %v264_v44 }
 0x14f   : > { %v1053_v48 = vpop.eup %1052 }
 0x150   : > { %v453_v50 = vmul.f32 %v449_v47, %v393_v62  ;;  %v467_v51 = vrot.slane %v449_v47, %v1466_v45  ;;  %v448_v52 = vmul.f32 %v1053_v48, %v264_v44 }
 0x152   : > { %v1055_v53 = vpop.eup %1054  ;;  %v452_v54 = vmul.f32 %v448_v52, %v392_v9  ;;  %v463_v55 = vrot.slane %v448_v52, %v1466_v45  ;;  %v457_v56 = vsub.f32 %v265_v49, %v453_v50  ;;  %v477_v59 = vmul.f32 %v1442_v22, %v467_v51 }
 0x153   : > { %v451_v57 = vmul.f32 %v1055_v53, %v264_v44 }
 0x154   : > { %v1057_v58 = vpop.eup %1056  ;;  %v456_v60 = vsub.f32 %v265_v49, %v452_v54  ;;  %v487_v61 = vrot.slane %v457_v56, %v1466_v45  ;;  %v476_v62 = vmul.f32 %v463_v55, %v1447_v25 }
 0x155   : > { %v455_v63 = vmul.f32 %v451_v57, %v395_v17  ;;  %v475_v0 = vrot.slane %v451_v57, %v1466_v45  ;;  %v450_v1 = vmul.f32 %v1057_v58, %v264_v44 }
 0x156   : > { %v483_v2 = vrot.slane %v456_v60, %v1466_v45  ;;  %v497_v3 = vadd.f32 %v487_v61, %v477_v59 }
 0x157   : > { %v454_v4 = vmul.f32 %v450_v1, %v394_v27  ;;  %v471_v5 = vrot.slane %v450_v1, %v1466_v45  ;;  %v459_v6 = vsub.f32 %v265_v49, %v455_v63  ;;  %v479_v8 = vmul.f32 %v1453_v30, %v475_v0 }
 0x158   : > { %v496_v7 = vadd.f32 %v483_v2, %v476_v62  ;;  %v501_v9 = vmul.f32 0.01, %v497_v3 }
 0x159   : > { %v458_v22 = vsub.f32 %v265_v49, %v454_v4  ;;  %v495_v10 = vrot.slane %v459_v6, %v1466_v45  ;;  %v478_v12 = vmul.f32 %v471_v5, %v1459_v37 }
 0x15a   : > { %v500_v11 = vmul.f32 0.01, %v496_v7  ;;  %v505_v16 = vmax.f32 %v497_v3, %v501_v9 }
 0x15b   : > { %v491_v13 = vrot.slane %v458_v22, %v1466_v45  ;;  %v499_v25 = vadd.f32 %v495_v10, %v479_v8 }
 0x15c   : > { %v504_v14 = vmax.f32 %v496_v7, %v500_v11 }
 0x15d   : > { %v498_v15 = vadd.f32 %v491_v13, %v478_v12  ;;  %v503_v17 = vmul.f32 0.01, %v499_v25 }
 0x15e   : > { %963 = vmatprep.mubr.f32.mxu1 %v504_v14 }
 0x15f   : > { %964 = vmatmul.mubr.f32.vlgmr.msra.gmra.mxu1 %v505_v16  ;;  %v502_v18 = vmul.f32 0.01, %v498_v15  ;;  %v507_v20 = vmax.f32 %v499_v25, %v503_v17 }
 0x161   : > { %v506_v19 = vmax.f32 %v498_v15, %v502_v18 }
 0x163   : > { %966 = vmatprep.mubr.f32.mxu1 %v506_v19 }
 0x164   : > { %967 = vmatmul.mubr.f32.gmra.mxu1 %v507_v20 }
 0x21f   : > { %v1480_v30 = vpop.f32.mrf.mxu1 }
 0x220   : > { %v615_v21 = vrot.slane %v1480_v30, 4  ;;  %v638_v37 = vmul.f32 %v1480_v30, %v1480_v30 }
 0x221   : > { %v1485_v23 = vpop.f32.mrf.mxu1 }
 0x222   : > { %v616_v24 = vadd.f32 %v1480_v30, %v615_v21  ;;  %v647_v26 = vrot.slane %v638_v37, 4  ;;  %v609_v27 = vrot.slane %v1485_v23, 4  ;;  %v637_v28 = vmul.f32 %v1485_v23, %v1485_v23 }
 0x224   : > { %v617_v29 = vrot.slane %v616_v24, 2  ;;  %v648_v31 = vadd.f32 %v647_v26, %v638_v37  ;;  %v610_v32 = vadd.f32 %v609_v27, %v1485_v23  ;;  %v641_v33 = vrot.slane %v637_v28, 4  ;;  %v1492_v34 = vpop.f32.mrf.mxu1 }
 0x225   : > { %v627_v35 = vrot.slane %v1492_v34, 4  ;;  %v640_v36 = vmul.f32 %v1492_v34, %v1492_v34 }
 0x226   : > { %v618_v38 = vadd.f32 %v617_v29, %v616_v24  ;;  %v649_v39 = vrot.slane %v648_v31, 2  ;;  %v611_v40 = vrot.slane %v610_v32, 2  ;;  %v642_v41 = vadd.f32 %v641_v33, %v637_v28  ;;  %v1497_v42 = vpop.f32.mrf.mxu1 }
 0x227   : > { %v628_v43 = vadd.f32 %v1492_v34, %v627_v35  ;;  %v659_v44 = vrot.slane %v640_v36, 4  ;;  %v621_v46 = vrot.slane %v1497_v42, 4  ;;  %v639_v47 = vmul.f32 %v1497_v42, %v1497_v42 }
 0x228   : > { %v619_v48 = vrot.slane %v618_v38, 1  ;;  %v650_v49 = vadd.f32 %v649_v39, %v648_v31  ;;  %v612_v50 = vadd.f32 %v611_v40, %v610_v32  ;;  %v643_v51 = vrot.slane %v642_v41, 2 }
 0x229   : > { %v629_v52 = vrot.slane %v628_v43, 2  ;;  %v660_v53 = vadd.f32 %v659_v44, %v640_v36  ;;  %v622_v54 = vadd.f32 %v621_v46, %v1497_v42  ;;  %v653_v55 = vrot.slane %v639_v47, 4  ;;  %v266_v44 = vld [vmem:[#allocation8 + $0x2] sm:$0x1] }
 0x22a   : > { %v620_v56 = vadd.f32 %v619_v48, %v618_v38  ;;  %v651_v57 = vrot.slane %v650_v49, 1  ;;  %v613_v58 = vrot.slane %v612_v50, 1  ;;  %v644_v59 = vadd.f32 %v643_v51, %v642_v41 }
 0x22b   : > { %v630_v60 = vadd.f32 %v629_v52, %v628_v43  ;;  %v661_v61 = vrot.slane %v660_v53, 2  ;;  %v623_v63 = vrot.slane %v622_v54, 2  ;;  %v654_v0 = vadd.f32 %v653_v55, %v639_v47 }
 0x22c   : > { %v634_v1 = vmul.f32 0.125, %v620_v56  ;;  %v652_v62 = vadd.f32 %v651_v57, %v650_v49  ;;  %v614_v2 = vadd.f32 %v613_v58, %v612_v50  ;;  %v645_v3 = vrot.slane %v644_v59, 1  ;;  %v267_v49 = vld [vmem:[#allocation8 + $0x3] sm:$0x1] }
 0x22d   : > { %v631_v4 = vrot.slane %v630_v60, 1  ;;  %v662_v5 = vadd.f32 %v661_v61, %v660_v53  ;;  %v624_v6 = vadd.f32 %v623_v63, %v622_v54  ;;  %v655_v7 = vrot.slane %v654_v0, 2 }
 0x22e   : > { %v666_v8 = vmul.f32 0.125, %v652_v62  ;;  %v670_v22 = vmul.f32 %v634_v1, %v634_v1  ;;  %v633_v9 = vmul.f32 0.125, %v614_v2  ;;  %v646_v10 = vadd.f32 %v645_v3, %v644_v59 }
 0x22f   : > { %v632_v11 = vadd.f32 %v631_v4, %v630_v60  ;;  %v663_v12 = vrot.slane %v662_v5, 1  ;;  %v625_v13 = vrot.slane %v624_v6, 1  ;;  %v656_v25 = vadd.f32 %v655_v7, %v654_v0 }
 0x230   : > { %v674_v14 = vsub.f32 %v666_v8, %v670_v22  ;;  %v665_v15 = vmul.f32 0.125, %v646_v10  ;;  %v669_v16 = vmul.f32 %v633_v9, %v633_v9 }
 0x231   : > { %v636_v17 = vmul.f32 0.125, %v632_v11  ;;  %v664_v18 = vadd.f32 %v663_v12, %v662_v5  ;;  %v626_v19 = vadd.f32 %v625_v13, %v624_v6  ;;  %v657_v20 = vrot.slane %v656_v25, 1 }
 0x232   : > { %v678_v21 = vmax.f32 %v674_v14, 0.0  ;;  %v673_v37 = vsub.f32 %v665_v15, %v669_v16 }
 0x233   : > { %v668_v24 = vmul.f32 0.125, %v664_v18  ;;  %v672_v26 = vmul.f32 %v636_v17, %v636_v17  ;;  %v635_v27 = vmul.f32 0.125, %v626_v19  ;;  %v658_v28 = vadd.f32 %v657_v20, %v656_v25 }
 0x234   : > { %v682_v29 = vadd.f32 1e-05, %v678_v21  ;;  %v677_v31 = vmax.f32 %v673_v37, 0.0 }
 0x235   : > { %v676_v32 = vsub.f32 %v668_v24, %v672_v26  ;;  %v667_v33 = vmul.f32 0.125, %v658_v28  ;;  %v671_v35 = vmul.f32 %v635_v27, %v635_v27 }
 0x236   : > { %1058 = vrsqrt.f32 %v682_v29  ;;  %v681_v36 = vadd.f32 1e-05, %v677_v31 }
 0x237   : > { %v680_v38 = vmax.f32 %v676_v32, 0.0  ;;  %v675_v39 = vsub.f32 %v667_v33, %v671_v35 }
 0x238   : > { %1060 = vrsqrt.f32 %v681_v36 }
 0x239   : > { %v684_v40 = vadd.f32 1e-05, %v680_v38  ;;  %v679_v41 = vmax.f32 %v675_v39, 0.0 }
 0x23b   : > { %1062 = vrsqrt.f32 %v684_v40  ;;  %v683_v43 = vadd.f32 1e-05, %v679_v41 }
 0x23d   : > { %1064 = vrsqrt.f32 %v683_v43 }
 0x243   : > { %v1059_v46 = vpop.eup %1058 }
 0x244   : > { %v690_v47 = vmul.f32 %v1059_v46, %v266_v44 }
 0x245   : > { %v1061_v48 = vpop.eup %1060 }
 0x246   : > { %v694_v50 = vmul.f32 %v690_v47, %v634_v1  ;;  %v708_v51 = vrot.slane %v690_v47, %v1466_v45  ;;  %v689_v52 = vmul.f32 %v1061_v48, %v266_v44 }
 0x248   : > { %v1063_v53 = vpop.eup %1062  ;;  %v698_v54 = vsub.f32 %v267_v49, %v694_v50  ;;  %v693_v55 = vmul.f32 %v689_v52, %v633_v9  ;;  %v704_v56 = vrot.slane %v689_v52, %v1466_v45  ;;  %v718_v59 = vmul.f32 %v1480_v30, %v708_v51 }
 0x249   : > { %v692_v57 = vmul.f32 %v1063_v53, %v266_v44 }
 0x24a   : > { %v1065_v58 = vpop.eup %1064  ;;  %v728_v60 = vrot.slane %v698_v54, %v1466_v45  ;;  %v697_v61 = vsub.f32 %v267_v49, %v693_v55  ;;  %v717_v2 = vmul.f32 %v704_v56, %v1485_v23 }
 0x24b   : > { %v696_v63 = vmul.f32 %v692_v57, %v636_v17  ;;  %v716_v0 = vrot.slane %v692_v57, %v1466_v45  ;;  %v691_v62 = vmul.f32 %v1065_v58, %v266_v44 }
 0x24c   : > { %v738_v1 = vadd.f32 %v728_v60, %v718_v59  ;;  %v724_v3 = vrot.slane %v697_v61, %v1466_v45 }
 0x24d   : > { %v700_v4 = vsub.f32 %v267_v49, %v696_v63  ;;  %v695_v5 = vmul.f32 %v691_v62, %v635_v27  ;;  %v712_v6 = vrot.slane %v691_v62, %v1466_v45  ;;  %v720_v8 = vmul.f32 %v1492_v34, %v716_v0 }
 0x24e   : > { %v742_v7 = vmul.f32 0.01, %v738_v1  ;;  %v737_v30 = vadd.f32 %v724_v3, %v717_v2 }
 0x24f   : > { %v736_v22 = vrot.slane %v700_v4, %v1466_v45  ;;  %v699_v9 = vsub.f32 %v267_v49, %v695_v5  ;;  %v719_v13 = vmul.f32 %v712_v6, %v1497_v42 }
 0x250   : > { %v746_v10 = vmax.f32 %v738_v1, %v742_v7  ;;  %v741_v11 = vmul.f32 0.01, %v737_v30 }
 0x251   : > { %v740_v12 = vadd.f32 %v736_v22, %v720_v8  ;;  %v732_v23 = vrot.slane %v699_v9, %v1466_v45 }
 0x252   : > { %750 = vst [vmem:[%s257_s21 + $0x8] sm:$0xff] %v746_v10  ;;  %v745_v25 = vmax.f32 %v737_v30, %v741_v11 }
 0x253   : > { %v744_v14 = vmul.f32 0.01, %v740_v12  ;;  %v739_v15 = vadd.f32 %v732_v23, %v719_v13 }
 0x254   : > { %749 = vst [vmem:[%s257_s21] sm:$0xff] %v745_v25 }
 0x255   : > { %v748_v34 = vmax.f32 %v740_v12, %v744_v14  ;;  %v743_v16 = vmul.f32 0.01, %v739_v15 }
 0x257   : > { %752 = vst [vmem:[%s257_s21 + $0x18] sm:$0xff] %v748_v34  ;;  %v747_v45 = vmax.f32 %v739_v15, %v743_v16 }
 0x259   : > { %751 = vst [vmem:[%s257_s21 + $0x10] sm:$0xff] %v747_v45 }
 0x25a   : > { %1185 = shalt.err (!%p1182_p10)
}
 0x25b   : > { %s1186_s9 = scalar_lea.hbm %s1522_s12, 512  ;;  %s1190_s26 = scalar_lea.hbm %s1571_s4, 1024 }
 0x25c   : > { %p1187_p6 = scmp.ne.s32.totalorder %s1522_s12, %s1186_s9  ;;  %p1191_p3 = scmp.lt.s32.totalorder %s1522_s12, %s1571_s4 }
 0x25d   : > { %p1192_p11 = scmp.lt.s32.totalorder %s1190_s26, %s1186_s9 }
 0x25e   : > { %p1188_p4 = pnand %p1187_p6, %p1588_p1 }
 0x25f   : > { %p1193_p5 = por %p1192_p11, %p1191_p3 }
 0x260   : > { %p1189_p8 = pneg %p1188_p4 }
 0x262   : > { %p1194_p7 = pnand %p1193_p5, %p1189_p8 }
 0x264   : > { %1197 = shalt.err (!%p1194_p7)
}
 0x265   : > { %s1253_s21 = smov 128   ;;  %s1254_s23 = smov 8  }
 0x266   : > { %983 = dma.vmem_to_hbm [thread:$0]  (%p1588_p1), %s1524_s6, 512, %s1522_s12, %s754_s14, %s1253_s21, %s1253_s21, %s1254_s23  }
 0x267 PF: > { %s782_s7 = sand.u32 1, %s1232_s15   ;;  %p1589_p12 = scmp.ne.s32.totalorder %s1577_s22, 0 }
 0x268   : > { %p1590_p9 = scmp.ge.s32.totalorder %s1244_s18, 2  ;;  %s783_s10 = scalar_lea.sflag [#allocation4], %s782_s7 }
 0x26a   : > { %p1000_p13 = pnand %p1590_p9, %p1589_p12 }
 0x26c   : > { %p1001_p0 = pneg %p1000_p13 }
 0x26e   : > { %1227 = dma.done.wait (%p1001_p0), %s783_s10, 512  }
 0x26f   : > { %1229 = vsyncadd (%p1001_p0), %s783_s10, 4294966784  ;;  %p19_p2 = scmp.ge.s32.totalorder %s1366_s24, 4   ;;  %s1591_s15 = smov %s1236_s16 }
 0x270   : > { %s1592_s16 = smov %s1240_s17  ;;  %s1593_s17 = smov %s1376_s27 }
 0x271   : > { %s1594_s18 = smov %s1366_s24  ;;  %21 = sbr.rel (!%p19_p2) target bundleno = 7 (0x7), region = 93 }
 0x276   :  { %788 = vsyncpa [#allocation3], 1 }
 0x277   :  { %790 = vsyncpa [#allocation3 + $0x1], 1 }
 0x278   :  { %791 = vsyncpa [#allocation6], 1 }
 0x279   :  { %792 = vsyncpa [#allocation9], 1 }
 0x27a   :  { %793 = vsyncpa [#allocation4], 1 }
 0x27b   :  { %795 = vsyncpa [#allocation4 + $0x1], 1 }

// kernel: tpu_custom_call.1
= control target key start
LH: loop header
LB: loop body
LE: loop exit
PB: predicated region body
PF: predicated region fallthrough
CT: control target
= control target key end

     0   :  { %9 = vsyncpa [#allocation3], 0  ;;  %s1567_s0 = inlined_call_operand.hbm [shape: f32[8,8,16], index: 0, kind: input, shape index: {}]   ;;  %s1568_s1 = inlined_call_operand.hbm [shape: f32[16,128], index: 1, kind: input, shape index: {}]   ;;  %s1569_s2 = inlined_call_operand.hbm [shape: f32[128,128], index: 2, kind: input, shape index: {}]   ;;  %s1570_s3 = inlined_call_operand.hbm [shape: f32[8,128], index: 3, kind: input, shape index: {}]   ;;  %s1571_s4 = inlined_call_operand.hbm [shape: f32[8,8,128], index: 4, kind: output, shape index: {}]  }
   0x1   :  { %11 = vsyncpa [#allocation3 + $0x1], 0 }
   0x2   :  { %12 = vsyncpa [#allocation6], 0 }
   0x3   :  { %13 = vsyncpa [#allocation9], 0 }
   0x4   :  { %14 = vsyncpa [#allocation4], 0 }
   0x5   :  { %16 = vsyncpa [#allocation4 + $0x1], 0  ;;  %s1280_s15 = smov 0   ;;  %s1282_s16 = smov 0  }
   0x6   :  { %s1284_s17 = smov 0   ;;  %s1286_s18 = smov 0  }
   0x7 LB: > { %s1301_s19 = sadd.s32 4294967295, %s1244_s18   ;;  %s869_s20 = sadd.s32 4294967294, %s1244_s18   ;;  %s1244_s18 = sphi %s1286_s18, %s1594_s18   ;;  %s1240_s17 = sphi %s1284_s17, %s1593_s17   ;;  %s1236_s16 = sphi %s1282_s16, %s1592_s16   ;;  %s1232_s15 = sphi %s1280_s15, %s1591_s15  }
   0x8   : > { %p42_p0 = scmp.ne.s32.totalorder %s1236_s16, %s1232_s15  ;;  %p1572_p1 = scmp.eq.s32.totalorder %s1301_s19, 0 }
   0x9   : > { %p129_p2 = scmp.eq.s32.totalorder %s1301_s19, 1  ;;  %p135_p3 = scmp.eq.s32.totalorder %s869_s20, 1 }
   0xa   : > { %p1310_p4 = por %p1572_p1, %p42_p0  ;;  %p870_p5 = scmp.ge.s32.totalorder %s1244_s18, 1 }
   0xb   : > { %p1315_p6 = por %p135_p3, %p42_p0  ;;  %p142_p7 = scmp.lt.s32.totalorder %s1244_s18, 3 }
   0xc   : > { %s1576_s21 = scalar_select %p1310_p4, 1, 0 }
   0xd   : > { %s1577_s22 = scalar_select %p1315_p6, 1, 0 }
   0xe   : > { %p1320_p8 = pnand %p870_p5, %p142_p7  ;;  %s1246_s24 = smov [#allocation5]  }
   0xf   : > { %s154_s25 = sshll.u32 %s1246_s24, 4  ;;  %s1247_s27 = smov [#allocation7]   ;;  %s155_s25 = int_to_ptr.vmem [resolvable:$true] %s154_s25 }
  0x10   : > { %s1578_s23 = scalar_select %p1320_p8, 1, 0 }
  0x11   : > { %p985_p9 = pneg %p1320_p8  ;;  %s167_s28 = sshll.u32 %s1247_s27, 4  ;;  %s168_s28 = int_to_ptr.vmem [resolvable:$true] %s167_s28 }
  0x12   : > { %s1248_s29 = smov [#allocation8]   ;;  %s1077_s5 = scalar_lea.vmem %s155_s25, 256 }
  0x13   : > { %p1329_p11 = pnand %p985_p9, %p1572_p1  ;;  %s181_s30 = sshll.u32 %s1248_s29, 4  ;;  %s182_s30 = int_to_ptr.vmem [resolvable:$true] %s181_s30 }
  0x14   : > { %p1078_p13 = scmp.ne.s32.totalorder %s155_s25, %s1077_s5  ;;  %p1085_p5 = scmp.lt.s32.totalorder %s155_s25, %s155_s25 }
  0x15   : > { %p1068_p12 = pneg %p1329_p11  ;;  %p1086_p7 = scmp.lt.s32.totalorder %s1077_s5, %s1077_s5 }
  0x17   : > { %p1080_p0 = pnand %p1078_p13, %p1068_p12  ;;  %p1087_p9 = por %p1086_p7, %p1085_p5 }
  0x19   : > { %p1081_p3 = pneg %p1080_p0 }
  0x1b   : > { %p1088_p10 = pnand %p1087_p9, %p1081_p3 }
  0x1d   : > { %1091 = shalt.err (!%p1088_p10)
}
  0x1e   : > { %s1249_s6 = smov 128   ;;  %s1250_s7 = smov 8  }
  0x1f   : > { %988 = dma.hbm_to_vmem [thread:$0]  (!%p1329_p11), %s1568_s1, 256, %s155_s25, [#allocation6], %s1249_s6, %s1249_s6, %s1250_s7  }
  0x20   : > { %s1103_s10 = scalar_lea.vmem %s168_s28, 2048  ;;  %p1111_p3 = scmp.lt.s32.totalorder %s168_s28, %s168_s28 }
  0x21   : > { %p1104_p13 = scmp.ne.s32.totalorder %s168_s28, %s1103_s10  ;;  %p1112_p10 = scmp.lt.s32.totalorder %s1103_s10, %s1103_s10 }
  0x23   : > { %p1106_p0 = pnand %p1104_p13, %p1068_p12  ;;  %p1113_p7 = por %p1112_p10, %p1111_p3 }
  0x25   : > { %p1107_p5 = pneg %p1106_p0 }
  0x27   : > { %p1114_p9 = pnand %p1113_p7, %p1107_p5 }
  0x29   : > { %1117 = shalt.err (!%p1114_p9)
}
  0x2a   : > { %991 = dma.hbm_to_vmem [thread:$0]  (!%p1329_p11), %s1569_s2, 2048, %s168_s28, [#allocation6], %s1249_s6, %s1249_s6, %s1250_s7  }
  0x2b   : > { %s1129_s13 = scalar_lea.vmem %s182_s30, 128  ;;  %p1137_p3 = scmp.lt.s32.totalorder %s182_s30, %s182_s30 }
  0x2c   : > { %p1130_p1 = scmp.ne.s32.totalorder %s182_s30, %s1129_s13  ;;  %p1138_p5 = scmp.lt.s32.totalorder %s1129_s13, %s1129_s13 }
  0x2e   : > { %p1132_p13 = pnand %p1130_p1, %p1068_p12  ;;  %p1139_p10 = por %p1138_p5, %p1137_p3 }
  0x30   : > { %p1133_p0 = pneg %p1132_p13 }
  0x32   : > { %p1140_p7 = pnand %p1139_p10, %p1133_p0 }
  0x34   : > { %1143 = shalt.err (!%p1140_p7)
}
  0x35   : > { %994 = dma.hbm_to_vmem [thread:$0]  (!%p1329_p11), %s1570_s3, 128, %s182_s30, [#allocation9]  }
  0x36   : > { %s1366_s24 = sadd.s32 1, %s1244_s18   ;;  %s29_s26 = sadd.s32 1, %s1240_s17 }
  0x37   : > { %s26_s25 = ssub.s32 %s1244_s18, %s1366_s24  ;;  %p36_p12 = scmp.ne.s32.totalorder %s1240_s17, %s1236_s16 }
  0x38   : > { %p27_p1 = scmp.eq.s32.totalorder %s26_s25, 0  ;;  %p37_p9 = scmp.eq.s32.totalorder %s1244_s18, 0 }
  0x39   : > { %p1006_p13 = scmp.lt.s32.totalorder %s1244_s18, 2  ;;  %p1380_p3 = por %p129_p2, %p36_p12 }
  0x3a   : > { %s1376_s27 = scalar_select %p27_p1, %s1240_s17, %s29_s26  }
  0x3b   : > { %p38_p0 = por %p37_p9, %p36_p12  ;;  %s192_s29 = sand.u32 1, %s1240_s17  }
  0x3c   : > { %s1580_s28 = scalar_select %p1380_p3, 1, 0 }
  0x3d   : > { %s893_s5 = sshll.u32 %s1244_s18, 9  ;;  %s875_s30 = sshll.u32 %s192_s29, 5 }
  0x3e   : > { %s1389_s10 = scalar_lea.hbm %s1567_s0, %s893_s5  ;;  %s196_s11 = scalar_lea.vmem [#allocation2], %s875_s30 }
  0x3f   : > { %s203_s12 = sshll.u32 %s196_s11, 4  ;;  %p1391_p11 = pnand %p1006_p13, %p38_p0  ;;  %s1395_s12 = int_to_ptr.vmem [resolvable:$true] %s203_s12 }
  0x40   : > { %s1397_s14 = scalar_lea.sflag [#allocation3], %s192_s29  ;;  %s1144_s20 = scalar_lea.hbm %s1389_s10, 512 }
  0x41   : > { %p1145_p2 = scmp.ne.s32.totalorder %s1389_s10, %s1144_s20  ;;  %p1146_p5 = pneg %p1391_p11 }
  0x42   : > { %s1149_s5 = scalar_lea.hbm %s1567_s0, 1024  ;;  %p1150_p1 = scmp.lt.s32.totalorder %s1389_s10, %s1567_s0 }
  0x43   : > { %p1147_p10 = pnand %p1146_p5, %p1145_p2  ;;  %p1151_p12 = scmp.lt.s32.totalorder %s1149_s5, %s1144_s20 }
  0x45   : > { %p1148_p7 = pneg %p1147_p10  ;;  %p1152_p9 = por %p1151_p12, %p1150_p1 }
  0x47   : > { %p1153_p13 = pnand %p1152_p9, %p1148_p7 }
  0x49   : > { %1156 = shalt.err (!%p1153_p13)
}
  0x4a   : > { %s1157_s29 = scalar_lea.vmem %s1395_s12, 512  ;;  %s1251_s9 = smov [#allocation2]  }
  0x4b   : > { %p1158_p0 = scmp.ne.s32.totalorder %s1395_s12, %s1157_s29  ;;  %s1162_s11 = sshll.u32 %s1251_s9, 4  ;;  %s1163_s11 = int_to_ptr.vmem [resolvable:$false] %s1162_s11 }
  0x4c   : > { %s1164_s25 = scalar_lea.vmem %s1163_s11, 1024  ;;  %p1165_p10 = scmp.lt.s32.totalorder %s1395_s12, %s1163_s11 }
  0x4d   : > { %p1160_p6 = pnand %p1158_p0, %p1146_p5  ;;  %p1166_p3 = scmp.lt.s32.totalorder %s1164_s25, %s1157_s29 }
  0x4f   : > { %p1161_p2 = pneg %p1160_p6  ;;  %p1167_p4 = por %p1166_p3, %p1165_p10 }
  0x51   : > { %p1168_p8 = pnand %p1167_p4, %p1161_p2 }
  0x53   : > { %1171 = shalt.err (!%p1168_p8)
}
  0x54   : > { %998 = dma.hbm_to_vmem [thread:$0]  (!%p1391_p11), %s1389_s10, 512, %s1395_s12, %s1397_s14, %s1249_s6, %s1249_s6, %s1250_s7  }
  0x55   : > { %p1582_p6 = scmp.ne.s32.totalorder %s1578_s23, 0 }
  0x56   : > { %s1424_s20 = sand.u32 (!%p1582_p6), 1, %s1236_s16   ;;  %p1583_p4 = scmp.ne.s32.totalorder (!%p1582_p6), %s1576_s21, 0 }
  0x57   : > { %215 = sbr.rel (%p1582_p6) target bundleno = 615 (0x267), region = 36  ;;  %s879_s26 = sshll.u32 (!%p1582_p6), %s1424_s20, 5 }
  0x58   : > { %s218_s5 = scalar_lea.sflag (!%p1582_p6), [#allocation3], %s1424_s20  ;;  %s221_s13 = scalar_lea.vmem (!%p1582_p6), [#allocation2], %s879_s26 }
  0x5c   : > { %1215 = dma.done.wait (%p1583_p4), %s218_s5, 512  }
  0x5d   : > { %1217 = vsyncadd (%p1583_p4), %s218_s5, 4294966784  ;;  %p1584_p8 = scmp.eq.s32.totalorder %s1301_s19, 0 }
  0x5f   : > { %1219 = dma.done.wait (%p1584_p8), [#allocation6], 2304   ;;  %p1585_p3 = pmov %p1584_p8 }
  0x61   : > { %1221 = vsyncadd (%p1585_p3), [#allocation6], 4294964992  ;;  %p1586_p11 = pmov %p1585_p3 }
  0x62   : > { %p1587_p5 = pmov %p1585_p3 }
  0x63   : > { %1223 = dma.done.wait (%p1586_p11), [#allocation9], 128  }
  0x64   : > { %1225 = vsyncadd (%p1587_p5), [#allocation9], 4294967168  ;;  %vm270_vm0 = vcmask 130048   ;;  %v269_v0 = vld [vmem:[#allocation5 + $0x8] sm:$0xff]  ;;  %v268_v1 = vld [vmem:[#allocation5] sm:$0xff]  ;;  %s257_s21 = scalar_lea.vmem [#allocation10], %s879_s26 }
  0x65   : > { %v260_v2 = vld [vmem:[%s221_s13] sm:$0xff]  ;;  %921 = vmatprep.subr.mxu0 %v269_v0  ;;  %v261_v3 = vld [vmem:[%s221_s13 + $0x8] sm:$0xff]  ;;  %v262_v4 = vld [vmem:[%s221_s13 + $0x10] sm:$0xff]  ;;  %s894_s23 = sshll.u32 %s1301_s19, 9  ;;  %s767_s6 = sshll.u32 %s257_s21, 4  ;;  %s1524_s6 = int_to_ptr.vmem [resolvable:$true] %s767_s6 }
  0x66   : > { %925 = vmatprep.mubr.msk.f32.mxu0 %vm270_vm0, %v260_v2  ;;  %922 = vmatpush3.msra.mxu0 %v269_v0  ;;  %v263_v5 = vld [vmem:[%s221_s13 + $0x18] sm:$0xff]  ;;  %v523_v6 = vld [vmem:[#allocation7 + $0x78] sm:$0xff]  ;;  %v522_v7 = vld [vmem:[#allocation7 + $0x70] sm:$0xff]  ;;  %s1522_s12 = scalar_lea.hbm %s1571_s4, %s894_s23  ;;  %s754_s14 = scalar_lea.sflag [#allocation4], %s1424_s20 }
  0x67   : > { %923 = vmatprep.subr.mxu0 %v268_v1  ;;  %931 = vmatprep.subr.mxu1 %v523_v6  ;;  %v521_v8 = vld [vmem:[#allocation7 + $0x68] sm:$0xff]  ;;  %v520_v9 = vld [vmem:[#allocation7 + $0x60] sm:$0xff]  ;;  %v519_v10 = vld [vmem:[#allocation7 + $0x58] sm:$0xff]  ;;  %s1172_s30 = scalar_lea.vmem %s1524_s6, 512  ;;  %p1588_p1 = scmp.ne.s32.totalorder %s1580_s28, 0 }
  0x68   : > { %924 = vmatpush3.msra.mxu0 %v268_v1  ;;  %932 = vmatpush3.msra.mxu1 %v523_v6  ;;  %v518_v11 = vld [vmem:[#allocation7 + $0x50] sm:$0xff]  ;;  %v517_v12 = vld [vmem:[#allocation7 + $0x48] sm:$0xff]  ;;  %v516_v13 = vld [vmem:[#allocation7 + $0x40] sm:$0xff]  ;;  %p1173_p7 = scmp.ne.s32.totalorder %s1524_s6, %s1172_s30  ;;  %s1252_s19 = smov [#allocation10]  }
  0x69   : > { %926 = vmatmul.mubr.msk.f32.vlgmr.msra.gmra.mxu0 %vm270_vm0, %v261_v3  ;;  %933 = vmatprep.subr.mxu1 %v522_v7  ;;  %v515_v14 = vld [vmem:[#allocation7 + $0x38] sm:$0xff]  ;;  %v514_v15 = vld [vmem:[#allocation7 + $0x30] sm:$0xff]  ;;  %v513_v16 = vld [vmem:[#allocation7 + $0x28] sm:$0xff]  ;;  %s1176_s8 = sshll.u32 %s1252_s19, 4  ;;  %s1177_s8 = int_to_ptr.vmem [resolvable:$false] %s1176_s8 }
  0x6a   : > { %928 = vmatprep.mubr.msk.f32.mxu0 %vm270_vm0, %v262_v4  ;;  %934 = vmatpush3.msra.mxu1 %v522_v7  ;;  %v512_v17 = vld [vmem:[#allocation7 + $0x20] sm:$0xff]  ;;  %v511_v18 = vld [vmem:[#allocation7 + $0x18] sm:$0xff]  ;;  %v510_v19 = vld [vmem:[#allocation7 + $0x10] sm:$0xff]  ;;  %p1174_p12 = pnand %p1173_p7, %p1588_p1  ;;  %s1178_s29 = scalar_lea.vmem %s1177_s8, 1024 }
  0x6b   : > { %935 = vmatprep.subr.mxu1 %v521_v8  ;;  %v509_v20 = vld [vmem:[#allocation7 + $0x8] sm:$0xff]  ;;  %v508_v21 = vld [vmem:[#allocation7] sm:$0xff]  ;;  %p1179_p13 = scmp.lt.s32.totalorder %s1524_s6, %s1177_s8  ;;  %p1180_p0 = scmp.lt.s32.totalorder %s1178_s29, %s1172_s30 }
  0x6c   : > { %936 = vmatpush3.msra.mxu1 %v521_v8  ;;  %p1175_p9 = pneg %p1174_p12 }
  0x6d   : > { %929 = vmatmul.mubr.msk.f32.gmra.mxu0 %vm270_vm0, %v263_v5  ;;  %937 = vmatprep.subr.mxu1 %v520_v9  ;;  %p1181_p2 = por %p1180_p0, %p1179_p13 }
  0x6e   : > { %938 = vmatpush3.msra.mxu1 %v520_v9 }
  0x6f   : > { %939 = vmatprep.subr.mxu1 %v519_v10  ;;  %p1182_p10 = pnand %p1181_p2, %p1175_p9 }
  0x70   : > { %940 = vmatpush3.msra.mxu1 %v519_v10 }
  0x71   : > { %941 = vmatprep.subr.mxu1 %v518_v11 }
  0x72   : > { %942 = vmatpush3.msra.mxu1 %v518_v11 }
  0x73   : > { %943 = vmatprep.subr.mxu1 %v517_v12 }
  0x74   : > { %944 = vmatpush3.msra.mxu1 %v517_v12 }
  0x75   : > { %945 = vmatprep.subr.mxu1 %v516_v13 }
  0x76   : > { %946 = vmatpush3.msra.mxu1 %v516_v13 }
  0x77   : > { %947 = vmatprep.subr.mxu1 %v515_v14 }
  0x78   : > { %948 = vmatpush3.msra.mxu1 %v515_v14 }
  0x79   : > { %949 = vmatprep.subr.mxu1 %v514_v15 }
  0x7a   : > { %950 = vmatpush3.msra.mxu1 %v514_v15 }
  0x7b   : > { %951 = vmatprep.subr.mxu1 %v513_v16 }
  0x7c   : > { %952 = vmatpush3.msra.mxu1 %v513_v16 }
  0x7d   : > { %953 = vmatprep.subr.mxu1 %v512_v17 }
  0x7e   : > { %954 = vmatpush3.msra.mxu1 %v512_v17 }
  0x7f   : > { %955 = vmatprep.subr.mxu1 %v511_v18 }
  0x80   : > { %956 = vmatpush3.msra.mxu1 %v511_v18 }
  0x81   : > { %957 = vmatprep.subr.mxu1 %v510_v19 }
  0x82   : > { %958 = vmatpush3.msra.mxu1 %v510_v19 }
  0x83   : > { %959 = vmatprep.subr.mxu1 %v509_v20 }
  0x84   : > { %960 = vmatpush3.msra.mxu1 %v509_v20 }
  0x85   : > { %961 = vmatprep.subr.mxu1 %v508_v21 }
  0x86   : > { %962 = vmatpush3.msra.mxu1 %v508_v21 }
 0x129   : > { %v1442_v22 = vpop.f32.mrf.mxu0 }
 0x12a   : > { %v374_v23 = vrot.slane %v1442_v22, 4  ;;  %v397_v24 = vmul.f32 %v1442_v22, %v1442_v22 }
 0x12b   : > { %v1447_v25 = vpop.f32.mrf.mxu0 }
 0x12c   : > { %v375_v26 = vadd.f32 %v1442_v22, %v374_v23  ;;  %v406_v27 = vrot.slane %v397_v24, 4  ;;  %v368_v28 = vrot.slane %v1447_v25, 4  ;;  %v396_v29 = vmul.f32 %v1447_v25, %v1447_v25 }
 0x12d   : > { %v1453_v30 = vpop.f32.mrf.mxu0 }
 0x12e   : > { %v376_v31 = vrot.slane %v375_v26, 2  ;;  %v407_v32 = vadd.f32 %v406_v27, %v397_v24  ;;  %v369_v33 = vadd.f32 %v368_v28, %v1447_v25  ;;  %v400_v34 = vrot.slane %v396_v29, 4 }
 0x12f   : > { %v386_v35 = vrot.slane %v1453_v30, 4  ;;  %v399_v36 = vmul.f32 %v1453_v30, %v1453_v30  ;;  %v1459_v37 = vpop.f32.mrf.mxu0 }
 0x130   : > { %v377_v38 = vadd.f32 %v376_v31, %v375_v26  ;;  %v408_v39 = vrot.slane %v407_v32, 2  ;;  %v370_v40 = vrot.slane %v369_v33, 2  ;;  %v401_v41 = vadd.f32 %v400_v34, %v396_v29 }
 0x131   : > { %v387_v42 = vadd.f32 %v1453_v30, %v386_v35  ;;  %v418_v43 = vrot.slane %v399_v36, 4  ;;  %v380_v44 = vrot.slane %v1459_v37, 4  ;;  %v398_v45 = vmul.f32 %v1459_v37, %v1459_v37 }
 0x132   : > { %v378_v46 = vrot.slane %v377_v38, 1  ;;  %v409_v47 = vadd.f32 %v408_v39, %v407_v32  ;;  %v371_v48 = vadd.f32 %v370_v40, %v369_v33  ;;  %v402_v49 = vrot.slane %v401_v41, 2 }
 0x133   : > { %v388_v50 = vrot.slane %v387_v42, 2  ;;  %v419_v51 = vadd.f32 %v418_v43, %v399_v36  ;;  %v381_v52 = vadd.f32 %v380_v44, %v1459_v37  ;;  %v412_v53 = vrot.slane %v398_v45, 4  ;;  %v264_v44 = vld [vmem:[#allocation8] sm:$0x1] }
 0x134   : > { %v379_v54 = vadd.f32 %v378_v46, %v377_v38  ;;  %v410_v55 = vrot.slane %v409_v47, 1  ;;  %v372_v56 = vrot.slane %v371_v48, 1  ;;  %v403_v57 = vadd.f32 %v402_v49, %v401_v41  ;;  %v265_v49 = vld [vmem:[#allocation8 + $0x1] sm:$0x1] }
 0x135   : > { %v389_v58 = vadd.f32 %v388_v50, %v387_v42  ;;  %v420_v59 = vrot.slane %v419_v51, 2  ;;  %v382_v60 = vrot.slane %v381_v52, 2  ;;  %v413_v61 = vadd.f32 %v412_v53, %v398_v45 }
 0x136   : > { %v393_v62 = vmul.f32 0.125, %v379_v54  ;;  %v411_v63 = vadd.f32 %v410_v55, %v409_v47  ;;  %v373_v0 = vadd.f32 %v372_v56, %v371_v48  ;;  %v404_v1 = vrot.slane %v403_v57, 1 }
 0x137   : > { %v390_v2 = vrot.slane %v389_v58, 1  ;;  %v421_v3 = vadd.f32 %v420_v59, %v419_v51  ;;  %v383_v4 = vadd.f32 %v382_v60, %v381_v52  ;;  %v414_v5 = vrot.slane %v413_v61, 2 }
 0x138   : > { %v425_v6 = vmul.f32 0.125, %v411_v63  ;;  %v429_v7 = vmul.f32 %v393_v62, %v393_v62  ;;  %v405_v8 = vadd.f32 %v404_v1, %v403_v57  ;;  %v392_v9 = vmul.f32 0.125, %v373_v0 }
 0x139   : > { %v391_v10 = vadd.f32 %v390_v2, %v389_v58  ;;  %v422_v11 = vrot.slane %v421_v3, 1  ;;  %v384_v12 = vrot.slane %v383_v4, 1  ;;  %v415_v13 = vadd.f32 %v414_v5, %v413_v61 }
 0x13a   : > { %v433_v14 = vsub.f32 %v425_v6, %v429_v7  ;;  %v424_v15 = vmul.f32 0.125, %v405_v8  ;;  %v428_v16 = vmul.f32 %v392_v9, %v392_v9  ;;  %v460_v41 = vlaneseq }
 0x13b   : > { %v395_v17 = vmul.f32 0.125, %v391_v10  ;;  %v423_v18 = vadd.f32 %v422_v11, %v421_v3  ;;  %v385_v19 = vadd.f32 %v384_v12, %v383_v4  ;;  %v416_v20 = vrot.slane %v415_v13, 1 }
 0x13c   : > { %v437_v21 = vmax.f32 %v433_v14, 0.0  ;;  %v432_v23 = vsub.f32 %v424_v15, %v428_v16  ;;  %v461_v43 = vshrl.u32 %v460_v41, 7 }
 0x13d   : > { %v427_v24 = vmul.f32 0.125, %v423_v18  ;;  %v431_v26 = vmul.f32 %v395_v17, %v395_v17  ;;  %v394_v27 = vmul.f32 0.125, %v385_v19  ;;  %v417_v28 = vadd.f32 %v416_v20, %v415_v13 }
 0x13e   : > { %v441_v29 = vadd.f32 1e-05, %v437_v21  ;;  %v436_v31 = vmax.f32 %v432_v23, 0.0  ;;  %v1466_v45 = vsub.s32 0, %v461_v43 }
 0x13f   : > { %v435_v32 = vsub.f32 %v427_v24, %v431_v26  ;;  %v426_v33 = vmul.f32 0.125, %v417_v28  ;;  %v430_v34 = vmul.f32 %v394_v27, %v394_v27 }
 0x140   : > { %1050 = vrsqrt.f32 %v441_v29  ;;  %v440_v35 = vadd.f32 1e-05, %v436_v31 }
 0x141   : > { %v439_v36 = vmax.f32 %v435_v32, 0.0  ;;  %v434_v38 = vsub.f32 %v426_v33, %v430_v34 }
 0x142   : > { %1052 = vrsqrt.f32 %v440_v35 }
 0x143   : > { %v443_v39 = vadd.f32 1e-05, %v439_v36  ;;  %v438_v40 = vmax.f32 %v434_v38, 0.0 }
 0x145   : > { %1054 = vrsqrt.f32 %v443_v39  ;;  %v442_v42 = vadd.f32 1e-05, %v438_v40 }
 0x147   : > { %1056 = vrsqrt.f32 %v442_v42 }
 0x14d   : > { %v1051_v46 = vpop.eup %1050 }
 0x14e   : > { %v449_v47 = vmul.f32 %v1051_v46, %v264_v44 }
 0x14f   : > { %v1053_v48 = vpop.eup %1052 }
 0x150   : > { %v453_v50 = vmul.f32 %v449_v47, %v393_v62  ;;  %v467_v51 = vrot.slane %v449_v47, %v1466_v45  ;;  %v448_v52 = vmul.f32 %v1053_v48, %v264_v44 }
 0x152   : > { %v1055_v53 = vpop.eup %1054  ;;  %v452_v54 = vmul.f32 %v448_v52, %v392_v9  ;;  %v463_v55 = vrot.slane %v448_v52, %v1466_v45  ;;  %v457_v56 = vsub.f32 %v265_v49, %v453_v50  ;;  %v477_v59 = vmul.f32 %v1442_v22, %v467_v51 }
 0x153   : > { %v451_v57 = vmul.f32 %v1055_v53, %v264_v44 }
 0x154   : > { %v1057_v58 = vpop.eup %1056  ;;  %v456_v60 = vsub.f32 %v265_v49, %v452_v54  ;;  %v487_v61 = vrot.slane %v457_v56, %v1466_v45  ;;  %v476_v62 = vmul.f32 %v463_v55, %v1447_v25 }
 0x155   : > { %v455_v63 = vmul.f32 %v451_v57, %v395_v17  ;;  %v475_v0 = vrot.slane %v451_v57, %v1466_v45  ;;  %v450_v1 = vmul.f32 %v1057_v58, %v264_v44 }
 0x156   : > { %v483_v2 = vrot.slane %v456_v60, %v1466_v45  ;;  %v497_v3 = vadd.f32 %v487_v61, %v477_v59 }
 0x157   : > { %v454_v4 = vmul.f32 %v450_v1, %v394_v27  ;;  %v471_v5 = vrot.slane %v450_v1, %v1466_v45  ;;  %v459_v6 = vsub.f32 %v265_v49, %v455_v63  ;;  %v479_v8 = vmul.f32 %v1453_v30, %v475_v0 }
 0x158   : > { %v496_v7 = vadd.f32 %v483_v2, %v476_v62  ;;  %v501_v9 = vmul.f32 0.01, %v497_v3 }
 0x159   : > { %v458_v22 = vsub.f32 %v265_v49, %v454_v4  ;;  %v495_v10 = vrot.slane %v459_v6, %v1466_v45  ;;  %v478_v12 = vmul.f32 %v471_v5, %v1459_v37 }
 0x15a   : > { %v500_v11 = vmul.f32 0.01, %v496_v7  ;;  %v505_v16 = vmax.f32 %v497_v3, %v501_v9 }
 0x15b   : > { %v491_v13 = vrot.slane %v458_v22, %v1466_v45  ;;  %v499_v25 = vadd.f32 %v495_v10, %v479_v8 }
 0x15c   : > { %v504_v14 = vmax.f32 %v496_v7, %v500_v11 }
 0x15d   : > { %v498_v15 = vadd.f32 %v491_v13, %v478_v12  ;;  %v503_v17 = vmul.f32 0.01, %v499_v25 }
 0x15e   : > { %963 = vmatprep.mubr.f32.mxu1 %v504_v14 }
 0x15f   : > { %964 = vmatmul.mubr.f32.vlgmr.msra.gmra.mxu1 %v505_v16  ;;  %v502_v18 = vmul.f32 0.01, %v498_v15  ;;  %v507_v20 = vmax.f32 %v499_v25, %v503_v17 }
 0x161   : > { %v506_v19 = vmax.f32 %v498_v15, %v502_v18 }
 0x163   : > { %966 = vmatprep.mubr.f32.mxu1 %v506_v19 }
 0x164   : > { %967 = vmatmul.mubr.f32.gmra.mxu1 %v507_v20 }
 0x21f   : > { %v1480_v30 = vpop.f32.mrf.mxu1 }
 0x220   : > { %v615_v21 = vrot.slane %v1480_v30, 4  ;;  %v638_v37 = vmul.f32 %v1480_v30, %v1480_v30 }
 0x221   : > { %v1485_v23 = vpop.f32.mrf.mxu1 }
 0x222   : > { %v616_v24 = vadd.f32 %v1480_v30, %v615_v21  ;;  %v647_v26 = vrot.slane %v638_v37, 4  ;;  %v609_v27 = vrot.slane %v1485_v23, 4  ;;  %v637_v28 = vmul.f32 %v1485_v23, %v1485_v23 }
 0x224   : > { %v617_v29 = vrot.slane %v616_v24, 2  ;;  %v648_v31 = vadd.f32 %v647_v26, %v638_v37  ;;  %v610_v32 = vadd.f32 %v609_v27, %v1485_v23  ;;  %v641_v33 = vrot.slane %v637_v28, 4  ;;  %v1492_v34 = vpop.f32.mrf.mxu1 }
 0x225   : > { %v627_v35 = vrot.slane %v1492_v34, 4  ;;  %v640_v36 = vmul.f32 %v1492_v34, %v1492_v34 }
 0x226   : > { %v618_v38 = vadd.f32 %v617_v29, %v616_v24  ;;  %v649_v39 = vrot.slane %v648_v31, 2  ;;  %v611_v40 = vrot.slane %v610_v32, 2  ;;  %v642_v41 = vadd.f32 %v641_v33, %v637_v28  ;;  %v1497_v42 = vpop.f32.mrf.mxu1 }
 0x227   : > { %v628_v43 = vadd.f32 %v1492_v34, %v627_v35  ;;  %v659_v44 = vrot.slane %v640_v36, 4  ;;  %v621_v46 = vrot.slane %v1497_v42, 4  ;;  %v639_v47 = vmul.f32 %v1497_v42, %v1497_v42 }
 0x228   : > { %v619_v48 = vrot.slane %v618_v38, 1  ;;  %v650_v49 = vadd.f32 %v649_v39, %v648_v31  ;;  %v612_v50 = vadd.f32 %v611_v40, %v610_v32  ;;  %v643_v51 = vrot.slane %v642_v41, 2 }
 0x229   : > { %v629_v52 = vrot.slane %v628_v43, 2  ;;  %v660_v53 = vadd.f32 %v659_v44, %v640_v36  ;;  %v622_v54 = vadd.f32 %v621_v46, %v1497_v42  ;;  %v653_v55 = vrot.slane %v639_v47, 4  ;;  %v266_v44 = vld [vmem:[#allocation8 + $0x2] sm:$0x1] }
 0x22a   : > { %v620_v56 = vadd.f32 %v619_v48, %v618_v38  ;;  %v651_v57 = vrot.slane %v650_v49, 1  ;;  %v613_v58 = vrot.slane %v612_v50, 1  ;;  %v644_v59 = vadd.f32 %v643_v51, %v642_v41 }
 0x22b   : > { %v630_v60 = vadd.f32 %v629_v52, %v628_v43  ;;  %v661_v61 = vrot.slane %v660_v53, 2  ;;  %v623_v63 = vrot.slane %v622_v54, 2  ;;  %v654_v0 = vadd.f32 %v653_v55, %v639_v47 }
 0x22c   : > { %v634_v1 = vmul.f32 0.125, %v620_v56  ;;  %v652_v62 = vadd.f32 %v651_v57, %v650_v49  ;;  %v614_v2 = vadd.f32 %v613_v58, %v612_v50  ;;  %v645_v3 = vrot.slane %v644_v59, 1  ;;  %v267_v49 = vld [vmem:[#allocation8 + $0x3] sm:$0x1] }
 0x22d   : > { %v631_v4 = vrot.slane %v630_v60, 1  ;;  %v662_v5 = vadd.f32 %v661_v61, %v660_v53  ;;  %v624_v6 = vadd.f32 %v623_v63, %v622_v54  ;;  %v655_v7 = vrot.slane %v654_v0, 2 }
 0x22e   : > { %v666_v8 = vmul.f32 0.125, %v652_v62  ;;  %v670_v22 = vmul.f32 %v634_v1, %v634_v1  ;;  %v633_v9 = vmul.f32 0.125, %v614_v2  ;;  %v646_v10 = vadd.f32 %v645_v3, %v644_v59 }
 0x22f   : > { %v632_v11 = vadd.f32 %v631_v4, %v630_v60  ;;  %v663_v12 = vrot.slane %v662_v5, 1  ;;  %v625_v13 = vrot.slane %v624_v6, 1  ;;  %v656_v25 = vadd.f32 %v655_v7, %v654_v0 }
 0x230   : > { %v674_v14 = vsub.f32 %v666_v8, %v670_v22  ;;  %v665_v15 = vmul.f32 0.125, %v646_v10  ;;  %v669_v16 = vmul.f32 %v633_v9, %v633_v9 }
 0x231   : > { %v636_v17 = vmul.f32 0.125, %v632_v11  ;;  %v664_v18 = vadd.f32 %v663_v12, %v662_v5  ;;  %v626_v19 = vadd.f32 %v625_v13, %v624_v6  ;;  %v657_v20 = vrot.slane %v656_v25, 1 }
 0x232   : > { %v678_v21 = vmax.f32 %v674_v14, 0.0  ;;  %v673_v37 = vsub.f32 %v665_v15, %v669_v16 }
 0x233   : > { %v668_v24 = vmul.f32 0.125, %v664_v18  ;;  %v672_v26 = vmul.f32 %v636_v17, %v636_v17  ;;  %v635_v27 = vmul.f32 0.125, %v626_v19  ;;  %v658_v28 = vadd.f32 %v657_v20, %v656_v25 }
 0x234   : > { %v682_v29 = vadd.f32 1e-05, %v678_v21  ;;  %v677_v31 = vmax.f32 %v673_v37, 0.0 }
 0x235   : > { %v676_v32 = vsub.f32 %v668_v24, %v672_v26  ;;  %v667_v33 = vmul.f32 0.125, %v658_v28  ;;  %v671_v35 = vmul.f32 %v635_v27, %v635_v27 }
 0x236   : > { %1058 = vrsqrt.f32 %v682_v29  ;;  %v681_v36 = vadd.f32 1e-05, %v677_v31 }
 0x237   : > { %v680_v38 = vmax.f32 %v676_v32, 0.0  ;;  %v675_v39 = vsub.f32 %v667_v33, %v671_v35 }
 0x238   : > { %1060 = vrsqrt.f32 %v681_v36 }
 0x239   : > { %v684_v40 = vadd.f32 1e-05, %v680_v38  ;;  %v679_v41 = vmax.f32 %v675_v39, 0.0 }
 0x23b   : > { %1062 = vrsqrt.f32 %v684_v40  ;;  %v683_v43 = vadd.f32 1e-05, %v679_v41 }
 0x23d   : > { %1064 = vrsqrt.f32 %v683_v43 }
 0x243   : > { %v1059_v46 = vpop.eup %1058 }
 0x244   : > { %v690_v47 = vmul.f32 %v1059_v46, %v266_v44 }
 0x245   : > { %v1061_v48 = vpop.eup %1060 }
 0x246   : > { %v694_v50 = vmul.f32 %v690_v47, %v634_v1  ;;  %v708_v51 = vrot.slane %v690_v47, %v1466_v45  ;;  %v689_v52 = vmul.f32 %v1061_v48, %v266_v44 }
 0x248   : > { %v1063_v53 = vpop.eup %1062  ;;  %v698_v54 = vsub.f32 %v267_v49, %v694_v50  ;;  %v693_v55 = vmul.f32 %v689_v52, %v633_v9  ;;  %v704_v56 = vrot.slane %v689_v52, %v1466_v45  ;;  %v718_v59 = vmul.f32 %v1480_v30, %v708_v51 }
 0x249   : > { %v692_v57 = vmul.f32 %v1063_v53, %v266_v44 }
 0x24a   : > { %v1065_v58 = vpop.eup %1064  ;;  %v728_v60 = vrot.slane %v698_v54, %v1466_v45  ;;  %v697_v61 = vsub.f32 %v267_v49, %v693_v55  ;;  %v717_v2 = vmul.f32 %v704_v56, %v1485_v23 }
 0x24b   : > { %v696_v63 = vmul.f32 %v692_v57, %v636_v17  ;;  %v716_v0 = vrot.slane %v692_v57, %v1466_v45  ;;  %v691_v62 = vmul.f32 %v1065_v58, %v266_v44 }
 0x24c   : > { %v738_v1 = vadd.f32 %v728_v60, %v718_v59  ;;  %v724_v3 = vrot.slane %v697_v61, %v1466_v45 }
 0x24d   : > { %v700_v4 = vsub.f32 %v267_v49, %v696_v63  ;;  %v695_v5 = vmul.f32 %v691_v62, %v635_v27  ;;  %v712_v6 = vrot.slane %v691_v62, %v1466_v45  ;;  %v720_v8 = vmul.f32 %v1492_v34, %v716_v0 }
 0x24e   : > { %v742_v7 = vmul.f32 0.01, %v738_v1  ;;  %v737_v30 = vadd.f32 %v724_v3, %v717_v2 }
 0x24f   : > { %v736_v22 = vrot.slane %v700_v4, %v1466_v45  ;;  %v699_v9 = vsub.f32 %v267_v49, %v695_v5  ;;  %v719_v13 = vmul.f32 %v712_v6, %v1497_v42 }
 0x250   : > { %v746_v10 = vmax.f32 %v738_v1, %v742_v7  ;;  %v741_v11 = vmul.f32 0.01, %v737_v30 }
 0x251   : > { %v740_v12 = vadd.f32 %v736_v22, %v720_v8  ;;  %v732_v23 = vrot.slane %v699_v9, %v1466_v45 }
 0x252   : > { %750 = vst [vmem:[%s257_s21 + $0x8] sm:$0xff] %v746_v10  ;;  %v745_v25 = vmax.f32 %v737_v30, %v741_v11 }
 0x253   : > { %v744_v14 = vmul.f32 0.01, %v740_v12  ;;  %v739_v15 = vadd.f32 %v732_v23, %v719_v13 }
 0x254   : > { %749 = vst [vmem:[%s257_s21] sm:$0xff] %v745_v25 }
 0x255   : > { %v748_v34 = vmax.f32 %v740_v12, %v744_v14  ;;  %v743_v16 = vmul.f32 0.01, %v739_v15 }
 0x257   : > { %752 = vst [vmem:[%s257_s21 + $0x18] sm:$0xff] %v748_v34  ;;  %v747_v45 = vmax.f32 %v739_v15, %v743_v16 }
 0x259   : > { %751 = vst [vmem:[%s257_s21 + $0x10] sm:$0xff] %v747_v45 }
 0x25a   : > { %1185 = shalt.err (!%p1182_p10)
}
 0x25b   : > { %s1186_s9 = scalar_lea.hbm %s1522_s12, 512  ;;  %s1190_s26 = scalar_lea.hbm %s1571_s4, 1024 }
 0x25c   : > { %p1187_p6 = scmp.ne.s32.totalorder %s1522_s12, %s1186_s9  ;;  %p1191_p3 = scmp.lt.s32.totalorder %s1522_s12, %s1571_s4 }
 0x25d   : > { %p1192_p11 = scmp.lt.s32.totalorder %s1190_s26, %s1186_s9 }
 0x25e   : > { %p1188_p4 = pnand %p1187_p6, %p1588_p1 }
 0x25f   : > { %p1193_p5 = por %p1192_p11, %p1191_p3 }
 0x260   : > { %p1189_p8 = pneg %p1188_p4 }
 0x262   : > { %p1194_p7 = pnand %p1193_p5, %p1189_p8 }
 0x264   : > { %1197 = shalt.err (!%p1194_p7)
}
 0x265   : > { %s1253_s21 = smov 128   ;;  %s1254_s23 = smov 8  }
 0x266   : > { %983 = dma.vmem_to_hbm [thread:$0]  (%p1588_p1), %s1524_s6, 512, %s1522_s12, %s754_s14, %s1253_s21, %s1253_s21, %s1254_s23  }
 0x267 PF: > { %s782_s7 = sand.u32 1, %s1232_s15   ;;  %p1589_p12 = scmp.ne.s32.totalorder %s1577_s22, 0 }
 0x268   : > { %p1590_p9 = scmp.ge.s32.totalorder %s1244_s18, 2  ;;  %s783_s10 = scalar_lea.sflag [#allocation4], %s782_s7 }
 0x26a   : > { %p1000_p13 = pnand %p1590_p9, %p1589_p12 }
 0x26c   : > { %p1001_p0 = pneg %p1000_p13 }
 0x26e   : > { %1227 = dma.done.wait (%p1001_p0), %s783_s10, 512  }
 0x26f   : > { %1229 = vsyncadd (%p1001_p0), %s783_s10, 4294966784  ;;  %p19_p2 = scmp.ge.s32.totalorder %s1366_s24, 4   ;;  %s1591_s15 = smov %s1236_s16 }
 0x270   : > { %s1592_s16 = smov %s1240_s17  ;;  %s1593_s17 = smov %s1376_s27 }
 0x271   : > { %s1594_s18 = smov %s1366_s24  ;;  %21 = sbr.rel (!%p19_p2) target bundleno = 7 (0x7), region = 93 }
 0x276   :  { %788 = vsyncpa [#allocation3], 1 }
 0x277   :  { %790 = vsyncpa [#allocation3 + $0x1], 1 }
 0x278   :  { %791 = vsyncpa [#allocation6], 1 }
 0x279   :  { %792 = vsyncpa [#allocation9], 1 }
 0x27a   :  { %793 = vsyncpa [#allocation4], 1 }
 0x27b   :  { %795 = vsyncpa [#allocation4 + $0x1], 1 }

</bundles_post_ra>
